<compile_context>
chip_gen: v7x
topology: tpu7x:2x2x1
jax: 0.10.0
libtpu: 0.0.40
codegen_flags: <defaults>
</compile_context>

<pallas_src>
import jax
import jax.numpy as jnp
from jax.experimental import pallas as pl
from jax.experimental.pallas import tpu as pltpu


IN_FEATURES = 784            # 28 * 28
HIDDEN = 512


def _round_up(x, m):
    return ((x + m - 1) // m) * m


# ------------------------------ Pallas kernel ------------------------------

def _image_encoder_kernel(x_ref, w1_ref, s1_ref, b1_ref,
                          w2_ref, s2_ref, b2_ref,
                          wh_ref, sh_ref, bh_ref, out_ref):
    """Fused Linear->ReLU->Linear->ReLU->merged{mu,logvar} head.

    x_ref  : (TB, 784)       f32   batch tile (cast to bf16 in-kernel)
    w*_ref : int8 weights stored (in, out); per-output-channel scales
             s*_ref (1, out) f32 applied after each dot (exact dequant:
             int8 values are exactly representable in bf16)
    b*_ref : (1, out)        f32   biases
    out_ref: (TB, HEAD_PAD)  f32   [:, :z]=mu, [:, z:2z]=logvar, rest zero
    """
    # h1 = relu(x @ W1 + b1)
    x = x_ref[...].astype(jnp.bfloat16)
    h = jnp.dot(x, w1_ref[...].astype(jnp.bfloat16),
                preferred_element_type=jnp.float32)
    h = jnp.maximum(h * s1_ref[...] + b1_ref[...], 0.0)
    # h2 = relu(h1 @ W2 + b2)
    h = jnp.dot(h.astype(jnp.bfloat16), w2_ref[...].astype(jnp.bfloat16),
                preferred_element_type=jnp.float32)
    h = jnp.maximum(h * s2_ref[...] + b2_ref[...], 0.0)
    # merged heads [mu | logvar | zero-pad] -> one matmul, lane-dense store
    o = jnp.dot(h.astype(jnp.bfloat16), wh_ref[...].astype(jnp.bfloat16),
                preferred_element_type=jnp.float32)
    out_ref[...] = o * sh_ref[...] + bh_ref[...]


# ------------------------------ JAX wrapper --------------------------------

def image_encoder_forward(x, kp, z_dim, *, batch_tile=256):
    """x: (N, 1, 28, 28) NCHW (or anything reshapeable to (N, 784)), f32."""
    n = x.shape[0]
    head_pad = kp["wh"].shape[1]

    # x.view(-1, 784); stays f32 -- no wrapper-side pad/cast op.
    x2d = x.reshape(n, IN_FEATURES)

    tb = min(_round_up(n, 8), batch_tile)
    n_pad = _round_up(n, tb)
    if n_pad != n:                       # static shapes: no-op when divisible
        x2d = jnp.pad(x2d, ((0, n_pad - n), (0, 0)))
    grid = (n_pad // tb,)

    def _const(i):                       # weights: same block every grid step
        return (0, 0)

    def _wspec(a):
        return pl.BlockSpec(a.shape, _const)

    flops = 2 * n_pad * (IN_FEATURES * HIDDEN + HIDDEN * HIDDEN
                         + HIDDEN * head_pad)
    bytes_accessed = (
        n_pad * IN_FEATURES * 4 + n_pad * head_pad * 4
        + sum(int(kp[k].size) for k in ("w1", "w2", "wh"))            # int8
        + sum(int(kp[k].size) * 4
              for k in ("s1", "b1", "s2", "b2", "sh", "bh")))          # f32

    heads = pl.pallas_call(
        _image_encoder_kernel,
        out_shape=jax.ShapeDtypeStruct((n_pad, head_pad), jnp.float32),
        grid_spec=pltpu.PrefetchScalarGridSpec(
            num_scalar_prefetch=0,
            grid=grid,
            in_specs=[
                pl.BlockSpec((tb, IN_FEATURES), lambda i: (i, 0)),     # x tile
                _wspec(kp["w1"]), _wspec(kp["s1"]), _wspec(kp["b1"]),
                _wspec(kp["w2"]), _wspec(kp["s2"]), _wspec(kp["b2"]),
                _wspec(kp["wh"]), _wspec(kp["sh"]), _wspec(kp["bh"]),
            ],
            out_specs=pl.BlockSpec((tb, head_pad), lambda i: (i, 0)),
        ),
        compiler_params=pltpu.CompilerParams(
            dimension_semantics=("parallel",)),
        cost_estimate=pl.CostEstimate(flops=flops, transcendentals=0,
                                      bytes_accessed=bytes_accessed),
    )(x2d, kp["w1"], kp["s1"], kp["b1"], kp["w2"], kp["s2"], kp["b2"],
      kp["wh"], kp["sh"], kp["bh"])

    heads = heads[:n]
    logits_mu = heads[:, :z_dim]
    logits_logvar = heads[:, z_dim:2 * z_dim]
    return logits_mu, logits_logvar


# --------------------------- parameter building ----------------------------

def build_image_encoder_params(key, z_dim):
    """f32 parameters equivalent to the PyTorch module.  Weights are stored
    transposed vs PyTorch ((in, out)) so y = x @ W + b == PyTorch x @ W.T + b.
    When loading trained PyTorch weights: transpose, then pack_params_for_kernel.
    """
    ks = jax.random.split(key, 8)

    def lin(kw, kb, fi, fo):
        bound = 1.0 / (fi ** 0.5)          # PyTorch nn.Linear default init
        w = jax.random.uniform(kw, (fi, fo), jnp.float32, -bound, bound)
        b = jax.random.uniform(kb, (fo,), jnp.float32, -bound, bound)
        return w, b

    w1, b1 = lin(ks[0], ks[1], IN_FEATURES, HIDDEN)     # l_input
    w2, b2 = lin(ks[2], ks[3], HIDDEN, HIDDEN)          # l_hidden
    wmu, bmu = lin(ks[4], ks[5], HIDDEN, z_dim)         # out_mu
    wlv, blv = lin(ks[6], ks[7], HIDDEN, z_dim)         # out_logvar
    return {"w1": w1, "b1": b1, "w2": w2, "b2": b2,
            "wmu": wmu, "bmu": bmu, "wlv": wlv, "blv": blv}


def _quantize_int8(w):
    """Symmetric per-output-channel int8 quantisation: w ~= q * scale."""
    amax = jnp.max(jnp.abs(w), axis=0, keepdims=True)
    scale = jnp.where(amax > 0, amax, 1.0) / 127.0
    q = jnp.clip(jnp.round(w / scale), -127, 127).astype(jnp.int8)
    return q, scale.astype(jnp.float32)


def pack_params_for_kernel(params, z_dim):
    """Merge mu/logvar heads (zero-padded to a lane-dense multiple of 128) and
    quantise all weights to int8 + per-output-channel f32 scales.

    NOTE: mu/logvar are only valid in the first 2*z_dim head columns; the
    zero-padded lanes must never be read downstream.
    """
    head_pad = _round_up(max(2 * z_dim, 128), 128)

    wh = jnp.concatenate([params["wmu"], params["wlv"]], axis=1)      # (512, 2z)
    wh = jnp.pad(wh, ((0, 0), (0, head_pad - 2 * z_dim)))
    bh = jnp.concatenate([params["bmu"], params["blv"]], axis=0)
    bh = jnp.pad(bh, (0, head_pad - 2 * z_dim))

    w1q, s1 = _quantize_int8(params["w1"])
    w2q, s2 = _quantize_int8(params["w2"])
    whq, sh = _quantize_int8(wh)

    return {
        "w1": w1q, "s1": s1, "b1": params["b1"].reshape(1, -1),
        "w2": w2q, "s2": s2, "b2": params["b2"].reshape(1, -1),
        "wh": whq, "sh": sh, "bh": bh.reshape(1, -1),
    }


# -------------------------- pure-f32 reference -----------------------------

def reference_forward_f32(x, params, z_dim):
    """Pure-f32 implementation of the PyTorch spec (HIGHEST matmul precision)."""
    del z_dim
    hi = jax.lax.Precision.HIGHEST
    x2d = x.reshape(-1, IN_FEATURES)
    h = jnp.maximum(jnp.dot(x2d, params["w1"], precision=hi) + params["b1"], 0.0)
    h = jnp.maximum(jnp.dot(h, params["w2"], precision=hi) + params["b2"], 0.0)
    mu = jnp.dot(h, params["wmu"], precision=hi) + params["bmu"]
    lv = jnp.dot(h, params["wlv"], precision=hi) + params["blv"]
    return mu, lv


# --------------------------------- main -------------------------------------

if __name__ == "__main__":
    Z_DIM = 32
    BATCH = 8

    root = jax.random.PRNGKey(0)
    k_params, k_img = jax.random.split(root)

    params = build_image_encoder_params(k_params, Z_DIM)     # f32, PyTorch spec
    kparams = pack_params_for_kernel(params, Z_DIM)          # merged + int8

    # image in PyTorch NCHW layout, as consumed by x.view(-1, 784)
    image = jax.random.normal(k_img, (BATCH, 1, 28, 28), jnp.float32)

    fwd = jax.jit(lambda kp, x: image_encoder_forward(x, kp, Z_DIM))
    mu, logvar = fwd(kparams, image)
    jax.block_until_ready((mu, logvar))

    assert mu.shape == (BATCH, Z_DIM)
    assert logvar.shape == (BATCH, Z_DIM)

    # Validate against the unquantised pure-f32 PyTorch-spec reference.
    ref_mu, ref_lv = jax.jit(
        lambda p, x: reference_forward_f32(x, p, Z_DIM))(params, image)
    assert jnp.allclose(mu, ref_mu, atol=2e-2, rtol=2e-2)
    assert jnp.allclose(logvar, ref_lv, atol=2e-2, rtol=2e-2)

    print("KERNEL_OK")
</pallas_src>

<mosaic_0001>
module attributes {stable_mosaic.version = 11 : i64} {
  func.func @_image_encoder_kernel(%arg0: i32, %arg1: memref<8x784xf32, #tpu.memory_space<vmem>>, %arg2: memref<784x512xi8, #tpu.memory_space<vmem>>, %arg3: memref<1x512xf32, #tpu.memory_space<vmem>>, %arg4: memref<1x512xf32, #tpu.memory_space<vmem>>, %arg5: memref<512x512xi8, #tpu.memory_space<vmem>>, %arg6: memref<1x512xf32, #tpu.memory_space<vmem>>, %arg7: memref<1x512xf32, #tpu.memory_space<vmem>>, %arg8: memref<512x128xi8, #tpu.memory_space<vmem>>, %arg9: memref<1x128xf32, #tpu.memory_space<vmem>>, %arg10: memref<1x128xf32, #tpu.memory_space<vmem>>, %arg11: memref<8x128xf32, #tpu.memory_space<vmem>>) attributes {dimension_semantics = [#tpu.dimension_semantics<parallel>], iteration_bounds = array<i64: 1>, scalar_prefetch = 0 : i64, scratch_operands = 0 : i64, tpu.core_type = #tpu.core_type<tc>, window_params = [{transform_indices = @transform_0, window_bounds = array<i64: 8, 784>}, {pipeline_mode = #tpu.pipeline_mode<synchronous>, transform_indices = @transform_1, window_bounds = array<i64: 784, 512>}, {pipeline_mode = #tpu.pipeline_mode<synchronous>, transform_indices = @transform_2, window_bounds = array<i64: 1, 512>}, {pipeline_mode = #tpu.pipeline_mode<synchronous>, transform_indices = @transform_3, window_bounds = array<i64: 1, 512>}, {pipeline_mode = #tpu.pipeline_mode<synchronous>, transform_indices = @transform_4, window_bounds = array<i64: 512, 512>}, {pipeline_mode = #tpu.pipeline_mode<synchronous>, transform_indices = @transform_5, window_bounds = array<i64: 1, 512>}, {pipeline_mode = #tpu.pipeline_mode<synchronous>, transform_indices = @transform_6, window_bounds = array<i64: 1, 512>}, {pipeline_mode = #tpu.pipeline_mode<synchronous>, transform_indices = @transform_7, window_bounds = array<i64: 512, 128>}, {pipeline_mode = #tpu.pipeline_mode<synchronous>, transform_indices = @transform_8, window_bounds = array<i64: 1, 128>}, {pipeline_mode = #tpu.pipeline_mode<synchronous>, transform_indices = @transform_9, window_bounds = array<i64: 1, 128>}, {transform_indices = @transform_10, window_bounds = array<i64: 8, 128>}]} {
    %c0 = arith.constant 0 : index
    %c0_0 = arith.constant 0 : index
    %0 = vector.load %arg1[%c0, %c0_0] : memref<8x784xf32, #tpu.memory_space<vmem>>, vector<8x784xf32>
    %1 = arith.truncf %0 : vector<8x784xf32> to vector<8x784xbf16>
    %c0_1 = arith.constant 0 : index
    %c0_2 = arith.constant 0 : index
    %2 = vector.load %arg2[%c0_1, %c0_2] : memref<784x512xi8, #tpu.memory_space<vmem>>, vector<784x512xi8>
    %3 = arith.sitofp %2 : vector<784x512xi8> to vector<784x512xbf16>
    %cst = arith.constant dense<0.000000e+00> : vector<8x512xf32>
    %4 = tpu.matmul %1, %3, %cst {dimension_numbers = #tpu.dot_dimension_numbers<[1], [0], [0], [1], [0, 0, 1, 1], [], []>} : vector<8x784xbf16>, vector<784x512xbf16>, vector<8x512xf32> -> vector<8x512xf32>
    %c0_3 = arith.constant 0 : index
    %c0_4 = arith.constant 0 : index
    %5 = vector.load %arg3[%c0_3, %c0_4] : memref<1x512xf32, #tpu.memory_space<vmem>>, vector<1x512xf32>
    %6 = vector.broadcast %5 : vector<1x512xf32> to vector<8x512xf32>
    %7 = arith.mulf %4, %6 : vector<8x512xf32>
    %c0_5 = arith.constant 0 : index
    %c0_6 = arith.constant 0 : index
    %8 = vector.load %arg4[%c0_5, %c0_6] : memref<1x512xf32, #tpu.memory_space<vmem>>, vector<1x512xf32>
    %9 = vector.broadcast %8 : vector<1x512xf32> to vector<8x512xf32>
    %10 = arith.addf %7, %9 : vector<8x512xf32>
    %cst_7 = arith.constant 0.000000e+00 : f32
    %11 = vector.broadcast %cst_7 : f32 to vector<8x512xf32>
    %12 = arith.maximumf %10, %11 : vector<8x512xf32>
    %13 = arith.truncf %12 : vector<8x512xf32> to vector<8x512xbf16>
    %c0_8 = arith.constant 0 : index
    %c0_9 = arith.constant 0 : index
    %14 = vector.load %arg5[%c0_8, %c0_9] : memref<512x512xi8, #tpu.memory_space<vmem>>, vector<512x512xi8>
    %15 = arith.sitofp %14 : vector<512x512xi8> to vector<512x512xbf16>
    %cst_10 = arith.constant dense<0.000000e+00> : vector<8x512xf32>
    %16 = tpu.matmul %13, %15, %cst_10 {dimension_numbers = #tpu.dot_dimension_numbers<[1], [0], [0], [1], [0, 0, 1, 1], [], []>} : vector<8x512xbf16>, vector<512x512xbf16>, vector<8x512xf32> -> vector<8x512xf32>
    %c0_11 = arith.constant 0 : index
    %c0_12 = arith.constant 0 : index
    %17 = vector.load %arg6[%c0_11, %c0_12] : memref<1x512xf32, #tpu.memory_space<vmem>>, vector<1x512xf32>
    %18 = vector.broadcast %17 : vector<1x512xf32> to vector<8x512xf32>
    %19 = arith.mulf %16, %18 : vector<8x512xf32>
    %c0_13 = arith.constant 0 : index
    %c0_14 = arith.constant 0 : index
    %20 = vector.load %arg7[%c0_13, %c0_14] : memref<1x512xf32, #tpu.memory_space<vmem>>, vector<1x512xf32>
    %21 = vector.broadcast %20 : vector<1x512xf32> to vector<8x512xf32>
    %22 = arith.addf %19, %21 : vector<8x512xf32>
    %cst_15 = arith.constant 0.000000e+00 : f32
    %23 = vector.broadcast %cst_15 : f32 to vector<8x512xf32>
    %24 = arith.maximumf %22, %23 : vector<8x512xf32>
    %25 = arith.truncf %24 : vector<8x512xf32> to vector<8x512xbf16>
    %c0_16 = arith.constant 0 : index
    %c0_17 = arith.constant 0 : index
    %26 = vector.load %arg8[%c0_16, %c0_17] : memref<512x128xi8, #tpu.memory_space<vmem>>, vector<512x128xi8>
    %27 = arith.sitofp %26 : vector<512x128xi8> to vector<512x128xbf16>
    %cst_18 = arith.constant dense<0.000000e+00> : vector<8x128xf32>
    %28 = tpu.matmul %25, %27, %cst_18 {dimension_numbers = #tpu.dot_dimension_numbers<[1], [0], [0], [1], [0, 0, 1, 1], [], []>} : vector<8x512xbf16>, vector<512x128xbf16>, vector<8x128xf32> -> vector<8x128xf32>
    %c0_19 = arith.constant 0 : index
    %c0_20 = arith.constant 0 : index
    %29 = vector.load %arg9[%c0_19, %c0_20] : memref<1x128xf32, #tpu.memory_space<vmem>>, vector<1x128xf32>
    %30 = vector.broadcast %29 : vector<1x128xf32> to vector<8x128xf32>
    %31 = arith.mulf %28, %30 : vector<8x128xf32>
    %c0_21 = arith.constant 0 : index
    %c0_22 = arith.constant 0 : index
    %32 = vector.load %arg10[%c0_21, %c0_22] : memref<1x128xf32, #tpu.memory_space<vmem>>, vector<1x128xf32>
    %33 = vector.broadcast %32 : vector<1x128xf32> to vector<8x128xf32>
    %34 = arith.addf %31, %33 : vector<8x128xf32>
    %c0_23 = arith.constant 0 : index
    %c0_24 = arith.constant 0 : index
    %35 = vector.load %arg11[%c0_23, %c0_24] : memref<8x128xf32, #tpu.memory_space<vmem>>, vector<8x128xf32>
    tpu.vector_store %arg11[%c0_23, %c0_24], %34 {strides = array<i32>} : memref<8x128xf32, #tpu.memory_space<vmem>>, vector<8x128xf32>,
    return
  }
  func.func @transform_0(%arg0: i32) -> (i32, i32) {
    %c0_i32 = arith.constant 0 : i32
    %c0_i32_0 = arith.constant 0 : i32
    return %arg0, %c0_i32 : i32, i32
  }
  func.func @transform_1(%arg0: i32) -> (i32, i32) {
    %c0_i32 = arith.constant 0 : i32
    %c0_i32_0 = arith.constant 0 : i32
    %c0_i32_1 = arith.constant 0 : i32
    return %c0_i32, %c0_i32_0 : i32, i32
  }
  func.func @transform_2(%arg0: i32) -> (i32, i32) {
    %c0_i32 = arith.constant 0 : i32
    %c0_i32_0 = arith.constant 0 : i32
    %c0_i32_1 = arith.constant 0 : i32
    return %c0_i32, %c0_i32_0 : i32, i32
  }
  func.func @transform_3(%arg0: i32) -> (i32, i32) {
    %c0_i32 = arith.constant 0 : i32
    %c0_i32_0 = arith.constant 0 : i32
    %c0_i32_1 = arith.constant 0 : i32
    return %c0_i32, %c0_i32_0 : i32, i32
  }
  func.func @transform_4(%arg0: i32) -> (i32, i32) {
    %c0_i32 = arith.constant 0 : i32
    %c0_i32_0 = arith.constant 0 : i32
    %c0_i32_1 = arith.constant 0 : i32
    return %c0_i32, %c0_i32_0 : i32, i32
  }
  func.func @transform_5(%arg0: i32) -> (i32, i32) {
    %c0_i32 = arith.constant 0 : i32
    %c0_i32_0 = arith.constant 0 : i32
    %c0_i32_1 = arith.constant 0 : i32
    return %c0_i32, %c0_i32_0 : i32, i32
  }
  func.func @transform_6(%arg0: i32) -> (i32, i32) {
    %c0_i32 = arith.constant 0 : i32
    %c0_i32_0 = arith.constant 0 : i32
    %c0_i32_1 = arith.constant 0 : i32
    return %c0_i32, %c0_i32_0 : i32, i32
  }
  func.func @transform_7(%arg0: i32) -> (i32, i32) {
    %c0_i32 = arith.constant 0 : i32
    %c0_i32_0 = arith.constant 0 : i32
    %c0_i32_1 = arith.constant 0 : i32
    return %c0_i32, %c0_i32_0 : i32, i32
  }
  func.func @transform_8(%arg0: i32) -> (i32, i32) {
    %c0_i32 = arith.constant 0 : i32
    %c0_i32_0 = arith.constant 0 : i32
    %c0_i32_1 = arith.constant 0 : i32
    return %c0_i32, %c0_i32_0 : i32, i32
  }
  func.func @transform_9(%arg0: i32) -> (i32, i32) {
    %c0_i32 = arith.constant 0 : i32
    %c0_i32_0 = arith.constant 0 : i32
    %c0_i32_1 = arith.constant 0 : i32
    return %c0_i32, %c0_i32_0 : i32, i32
  }
  func.func @transform_10(%arg0: i32) -> (i32, i32) {
    %c0_i32 = arith.constant 0 : i32
    %c0_i32_0 = arith.constant 0 : i32
    return %arg0, %c0_i32 : i32, i32
  }
}

</mosaic_0001>

<bundles_post_ra>
// kernel: _lambda_.1
= control target key start
LH: loop header
LB: loop body
LE: loop exit
PB: predicated region body
PF: predicated region fallthrough
CT: control target
= control target key end

     0   :  { %15 = vsyncpa [#allocation3], 0  ;;  %s3099_s0 = inlined_call_operand.vmem [shape: f32[8,784], index: 0, kind: input, shape index: {}]   ;;  %s3100_s1 = inlined_call_operand.vmem [shape: s8[784,512], index: 1, kind: input, shape index: {}]   ;;  %s3101_s2 = inlined_call_operand.vmem [shape: f32[1,512], index: 2, kind: input, shape index: {}]   ;;  %s3102_s3 = inlined_call_operand.vmem [shape: f32[1,512], index: 3, kind: input, shape index: {}]   ;;  %s3103_s4 = inlined_call_operand.hbm [shape: s8[512,512], index: 4, kind: input, shape index: {}]   ;;  %s3104_s5 = inlined_call_operand.vmem [shape: f32[1,512], index: 5, kind: input, shape index: {}]   ;;  %s3105_s6 = inlined_call_operand.vmem [shape: f32[1,512], index: 6, kind: input, shape index: {}]   ;;  %s3106_s7 = inlined_call_operand.hbm [shape: s8[512,128], index: 7, kind: input, shape index: {}]   ;;  %s3107_s8 = inlined_call_operand.vmem [shape: f32[1,128], index: 8, kind: input, shape index: {}]   ;;  %s3108_s9 = inlined_call_operand.vmem [shape: f32[1,128], index: 9, kind: input, shape index: {}]   ;;  %s3109_s10 = inlined_call_operand.vmem [shape: f32[8,128], index: 10, kind: output, shape index: {}]  }
   0x1   :  { %16 = vsyncpa [#allocation5], 0  ;;  %s2642_s13 = smov [#allocation2]   ;;  %s2594_s17 = scalar_lea.hbm %s3103_s4, 8192 }
   0x2   :  { %s30_s14 = sshll.u32 %s2642_s13, 4  ;;  %p2595_p0 = scmp.ne.s32.totalorder %s3103_s4, %s2594_s17  ;;  %s31_s14 = int_to_ptr.vmem [resolvable:$true] %s30_s14 }
   0x3   :  { %p2598_p1 = scmp.lt.u32.totalorder %s2594_s17, %s3103_s4 }
   0x5   :  { %p2600_p2 = pnand %p2598_p1, %p2595_p0 }
   0x7   :  { %2603 = shalt.err (!%p2600_p2)
}
   0x8   :  { %s2604_s22 = scalar_lea.vmem %s31_s14, 8192  ;;  %p2609_p4 = scmp.lt.s32.totalorder %s31_s14, %s31_s14 }
   0x9   :  { %p2605_p3 = scmp.ne.s32.totalorder %s31_s14, %s2604_s22  ;;  %p2610_p5 = scmp.lt.s32.totalorder %s2604_s22, %s2604_s22 }
   0xb   :  { %p2611_p6 = por %p2610_p5, %p2609_p4 }
   0xd   :  { %p2612_p7 = pnand %p2611_p6, %p2605_p3 }
   0xf   :  { %2615 = shalt.err (!%p2612_p7)
}
  0x10   :  { %s2643_s23 = smov 512   ;;  %s2644_s24 = smov 32  }
  0x11   :  { %36 = dma.hbm_to_vmem [thread:$0]  %s3103_s4, 8192, %s31_s14, [#allocation3], %s2643_s23, %s2643_s23, %s2644_s24  }
  0x12   :  { %s2645_s27 = smov [#allocation4]   ;;  %s2616_s11 = scalar_lea.hbm %s3106_s7, 2048 }
  0x13   :  { %s46_s28 = sshll.u32 %s2645_s27, 4  ;;  %p2617_p8 = scmp.ne.s32.totalorder %s3106_s7, %s2616_s11  ;;  %s47_s28 = int_to_ptr.vmem [resolvable:$true] %s46_s28 }
  0x14   :  { %p2620_p9 = scmp.lt.u32.totalorder %s2616_s11, %s3106_s7 }
  0x16   :  { %p2622_p10 = pnand %p2620_p9, %p2617_p8 }
  0x18   :  { %2625 = shalt.err (!%p2622_p10)
}
  0x19   :  { %s2626_s17 = scalar_lea.vmem %s47_s28, 2048  ;;  %p2631_p12 = scmp.lt.s32.totalorder %s47_s28, %s47_s28 }
  0x1a   :  { %p2627_p11 = scmp.ne.s32.totalorder %s47_s28, %s2626_s17  ;;  %p2632_p13 = scmp.lt.s32.totalorder %s2626_s17, %s2626_s17 }
  0x1c   :  { %p2633_p0 = por %p2632_p13, %p2631_p12 }
  0x1e   :  { %p2634_p1 = pnand %p2633_p0, %p2627_p11 }
  0x20   :  { %2637 = shalt.err (!%p2634_p1)
}
  0x21   :  { %s2646_s4 = smov 128   ;;  %s2647_s14 = smov 8  }
  0x22   :  { %52 = dma.hbm_to_vmem [thread:$0]  %s3106_s7, 2048, %s47_s28, [#allocation5], %s2646_s4, %s2646_s4, %s2647_s14  }
  0x23   :  { %2638 = dma.done.wait [#allocation3], 8192  }
  0x24   :  { %2639 = vsyncadd [#allocation3], 4294959104 }
  0x25   :  { %2640 = dma.done.wait [#allocation5], 2048  }
  0x26   :  { %2641 = vsyncadd [#allocation5], 4294965248  ;;  %v78_v0 = vld [vmem:[%s3100_s1] sm:$0xff]  ;;  %v79_v1 = vld [vmem:[%s3100_s1 + $0x8] sm:$0xff]  ;;  %vm1352_vm0 = vcmask 130048  }
  0x27   :  { %v80_v2 = vld [vmem:[%s3100_s1 + $0x10] sm:$0xff]  ;;  %v176_v3 = vunpack.c.l.s8.bf16 %v78_v0  ;;  %v178_v4 = vunpack.c.l.s8.bf16 %v79_v1  ;;  %v177_v5 = vunpack.c.h.s8.bf16 %v78_v0  ;;  %v179_v6 = vunpack.c.h.s8.bf16 %v79_v1  ;;  %v81_v7 = vld [vmem:[%s3100_s1 + $0x18] sm:$0xff]  ;;  %v82_v12 = vld [vmem:[%s3100_s1 + $0x20] sm:$0xff] }
  0x28   :  { %v180_v8 = vunpack.c.l.s8.bf16 %v80_v2  ;;  %v182_v9 = vunpack.c.l.s8.bf16 %v81_v7  ;;  %v181_v10 = vunpack.c.h.s8.bf16 %v80_v2  ;;  %v183_v11 = vunpack.c.h.s8.bf16 %v81_v7  ;;  %v83_v13 = vld [vmem:[%s3100_s1 + $0x28] sm:$0xff]  ;;  %v84_v18 = vld [vmem:[%s3100_s1 + $0x30] sm:$0xff]  ;;  %v85_v19 = vld [vmem:[%s3100_s1 + $0x38] sm:$0xff] }
  0x29   :  { %v2312_v14 = vcombine.high %v176_v3, %v178_v4  ;;  %v2314_v15 = vcombine.high %v177_v5, %v179_v6  ;;  %v2311_v16 = vcombine.low %v176_v3, %v178_v4  ;;  %v2313_v17 = vcombine.low %v177_v5, %v179_v6  ;;  %v86_v34 = vld [vmem:[%s3100_s1 + $0x40] sm:$0xff]  ;;  %v87_v35 = vld [vmem:[%s3100_s1 + $0x48] sm:$0xff]  ;;  %v88_v44 = vld [vmem:[%s3100_s1 + $0x50] sm:$0xff] }
  0x2a   :  { %v2316_v20 = vcombine.high %v180_v8, %v182_v9  ;;  %v2318_v21 = vcombine.high %v181_v10, %v183_v11  ;;  %v184_v22 = vunpack.c.l.s8.bf16 %v82_v12  ;;  %v186_v23 = vunpack.c.l.s8.bf16 %v83_v13  ;;  %v89_v45 = vld [vmem:[%s3100_s1 + $0x58] sm:$0xff]  ;;  %v90_v54 = vld [vmem:[%s3100_s1 + $0x60] sm:$0xff]  ;;  %v91_v55 = vld [vmem:[%s3100_s1 + $0x68] sm:$0xff] }
  0x2b   :  { %1356 = vmatprep.subr.bf16.mxu0 %v2312_v14  ;;  %1520 = vmatprep.subr.bf16.mxu1 %v2314_v15  ;;  %v185_v24 = vunpack.c.h.s8.bf16 %v82_v12  ;;  %v187_v25 = vunpack.c.h.s8.bf16 %v83_v13  ;;  %v2315_v26 = vcombine.low %v180_v8, %v182_v9  ;;  %v2317_v27 = vcombine.low %v181_v10, %v183_v11  ;;  %v92_v0 = vld [vmem:[%s3100_s1 + $0x70] sm:$0xff]  ;;  %v93_v1 = vld [vmem:[%s3100_s1 + $0x78] sm:$0xff]  ;;  %v94_v10 = vld [vmem:[%s3100_s1 + $0x80] sm:$0xff] }
  0x2c   :  { %1357 = vmatpush1.bf16.msra.mxu0 %v2311_v16  ;;  %1521 = vmatpush1.bf16.msra.mxu1 %v2313_v17  ;;  %v188_v28 = vunpack.c.l.s8.bf16 %v84_v18  ;;  %v190_v29 = vunpack.c.l.s8.bf16 %v85_v19  ;;  %v2320_v30 = vcombine.high %v184_v22, %v186_v23  ;;  %v189_v32 = vunpack.c.h.s8.bf16 %v84_v18  ;;  %v95_v11 = vld [vmem:[%s3100_s1 + $0x88] sm:$0xff] }
  0x2d   :  { %1358 = vmatprep.subr.bf16.mxu0 %v2316_v20  ;;  %1522 = vmatprep.subr.bf16.mxu1 %v2318_v21  ;;  %v2322_v31 = vcombine.high %v185_v24, %v187_v25  ;;  %v191_v33 = vunpack.c.h.s8.bf16 %v85_v19  ;;  %v2319_v36 = vcombine.low %v184_v22, %v186_v23  ;;  %v2321_v37 = vcombine.low %v185_v24, %v187_v25  ;;  %v96_v20 = vld [vmem:[%s3100_s1 + $0x90] sm:$0xff]  ;;  %v97_v21 = vld [vmem:[%s3100_s1 + $0x98] sm:$0xff] }
  0x2e   :  { %v2324_v38 = vcombine.high %v188_v28, %v190_v29  ;;  %v192_v39 = vunpack.c.l.s8.bf16 %v86_v34  ;;  %v194_v41 = vunpack.c.l.s8.bf16 %v87_v35  ;;  %v193_v42 = vunpack.c.h.s8.bf16 %v86_v34 }
  0x2f   :  { %v2326_v40 = vcombine.high %v189_v32, %v191_v33  ;;  %v195_v43 = vunpack.c.h.s8.bf16 %v87_v35  ;;  %v2323_v46 = vcombine.low %v188_v28, %v190_v29  ;;  %v2325_v47 = vcombine.low %v189_v32, %v191_v33  ;;  %v99_v32 = vld [vmem:[%s3100_s1 + $0xa8] sm:$0xff] }
  0x30   :  { %1359 = vmatpush1.bf16.msra.mxu0 %v2315_v26  ;;  %1523 = vmatpush1.bf16.msra.mxu1 %v2317_v27  ;;  %v196_v48 = vunpack.c.l.s8.bf16 %v88_v44  ;;  %v198_v49 = vunpack.c.l.s8.bf16 %v89_v45  ;;  %v2328_v50 = vcombine.high %v192_v39, %v194_v41  ;;  %v197_v52 = vunpack.c.h.s8.bf16 %v88_v44  ;;  %v65_v26 = vld [vmem:[%s3099_s0 + $0x8] sm:$0xff] }
  0x31   :  { %1360 = vmatprep.subr.bf16.mxu0 %v2320_v30  ;;  %1524 = vmatprep.subr.bf16.mxu1 %v2322_v31  ;;  %v2330_v51 = vcombine.high %v193_v42, %v195_v43  ;;  %v199_v53 = vunpack.c.h.s8.bf16 %v89_v45  ;;  %v2327_v56 = vcombine.low %v192_v39, %v194_v41  ;;  %v2329_v57 = vcombine.low %v193_v42, %v195_v43  ;;  %v98_v31 = vld [vmem:[%s3100_s1 + $0xa0] sm:$0xff]  ;;  %v100_v42 = vld [vmem:[%s3100_s1 + $0xb0] sm:$0xff]  ;;  %v101_v43 = vld [vmem:[%s3100_s1 + $0xb8] sm:$0xff] }
  0x32   :  { %v2332_v58 = vcombine.high %v196_v48, %v198_v49  ;;  %v200_v59 = vunpack.c.l.s8.bf16 %v90_v54  ;;  %v202_v61 = vunpack.c.l.s8.bf16 %v91_v55  ;;  %v201_v62 = vunpack.c.h.s8.bf16 %v90_v54 }
  0x33   :  { %v2334_v60 = vcombine.high %v197_v52, %v199_v53  ;;  %v203_v63 = vunpack.c.h.s8.bf16 %v91_v55  ;;  %v2331_v2 = vcombine.low %v196_v48, %v198_v49  ;;  %v2333_v3 = vcombine.low %v197_v52, %v199_v53  ;;  %v102_v52 = vld [vmem:[%s3100_s1 + $0xc0] sm:$0xff]  ;;  %v103_v53 = vld [vmem:[%s3100_s1 + $0xc8] sm:$0xff] }
  0x34   :  { %1361 = vmatpush1.bf16.msra.mxu0 %v2319_v36  ;;  %1525 = vmatpush1.bf16.msra.mxu1 %v2321_v37  ;;  %v204_v4 = vunpack.c.l.s8.bf16 %v92_v0  ;;  %v206_v5 = vunpack.c.l.s8.bf16 %v93_v1  ;;  %v2336_v6 = vcombine.high %v200_v59, %v202_v61  ;;  %v205_v8 = vunpack.c.h.s8.bf16 %v92_v0 }
  0x35   :  { %1362 = vmatprep.subr.bf16.mxu0 %v2324_v38  ;;  %1526 = vmatprep.subr.bf16.mxu1 %v2326_v40  ;;  %v2338_v7 = vcombine.high %v201_v62, %v203_v63  ;;  %v207_v9 = vunpack.c.h.s8.bf16 %v93_v1  ;;  %v2335_v12 = vcombine.low %v200_v59, %v202_v61  ;;  %v2337_v13 = vcombine.low %v201_v62, %v203_v63  ;;  %v104_v62 = vld [vmem:[%s3100_s1 + $0xd0] sm:$0xff]  ;;  %v105_v63 = vld [vmem:[%s3100_s1 + $0xd8] sm:$0xff] }
  0x36   :  { %v2340_v14 = vcombine.high %v204_v4, %v206_v5  ;;  %v208_v15 = vunpack.c.l.s8.bf16 %v94_v10  ;;  %v210_v17 = vunpack.c.l.s8.bf16 %v95_v11  ;;  %v209_v18 = vunpack.c.h.s8.bf16 %v94_v10 }
  0x37   :  { %v2342_v16 = vcombine.high %v205_v8, %v207_v9  ;;  %v211_v19 = vunpack.c.h.s8.bf16 %v95_v11  ;;  %v2339_v22 = vcombine.low %v204_v4, %v206_v5  ;;  %v2341_v23 = vcombine.low %v205_v8, %v207_v9  ;;  %v106_v8 = vld [vmem:[%s3100_s1 + $0xe0] sm:$0xff]  ;;  %v107_v9 = vld [vmem:[%s3100_s1 + $0xe8] sm:$0xff] }
  0x38   :  { %1363 = vmatpush1.bf16.msra.mxu0 %v2323_v46  ;;  %1527 = vmatpush1.bf16.msra.mxu1 %v2325_v47  ;;  %v212_v24 = vunpack.c.l.s8.bf16 %v96_v20  ;;  %v214_v25 = vunpack.c.l.s8.bf16 %v97_v21  ;;  %v2344_v27 = vcombine.high %v208_v15, %v210_v17  ;;  %v213_v29 = vunpack.c.h.s8.bf16 %v96_v20 }
  0x39   :  { %1364 = vmatprep.subr.bf16.mxu0 %v2328_v50  ;;  %1528 = vmatprep.subr.bf16.mxu1 %v2330_v51  ;;  %v2346_v28 = vcombine.high %v209_v18, %v211_v19  ;;  %v215_v30 = vunpack.c.h.s8.bf16 %v97_v21  ;;  %v72_v33 = vpack.c.bf16 %v65_v26, %v65_v26  ;;  %v2343_v34 = vcombine.low %v208_v15, %v210_v17 }
  0x3a   :  { %v2345_v35 = vcombine.low %v209_v18, %v211_v19  ;;  %v2348_v36 = vcombine.high %v212_v24, %v214_v25  ;;  %v216_v37 = vunpack.c.l.s8.bf16 %v98_v31  ;;  %v218_v39 = vunpack.c.l.s8.bf16 %v99_v32  ;;  %v108_v18 = vld [vmem:[%s3100_s1 + $0xf0] sm:$0xff]  ;;  %v109_v19 = vld [vmem:[%s3100_s1 + $0xf8] sm:$0xff] }
  0x3b   :  { %v2350_v38 = vcombine.high %v213_v29, %v215_v30  ;;  %v217_v40 = vunpack.c.h.s8.bf16 %v98_v31  ;;  %v219_v41 = vunpack.c.h.s8.bf16 %v99_v32  ;;  %1388 = vmatprep.mubr.bf16.mxu0 %v72_v33  ;;  %1552 = vmatprep.mubr.bf16.mxu1 %v72_v33  ;;  %v2347_v44 = vcombine.low %v212_v24, %v214_v25 }
  0x3c   :  { %1365 = vmatpush1.bf16.msra.mxu0 %v2327_v56  ;;  %1529 = vmatpush1.bf16.msra.mxu1 %v2329_v57  ;;  %v2349_v45 = vcombine.low %v213_v29, %v215_v30  ;;  %v220_v46 = vunpack.c.l.s8.bf16 %v100_v42  ;;  %v222_v47 = vunpack.c.l.s8.bf16 %v101_v43  ;;  %v2352_v48 = vcombine.high %v216_v37, %v218_v39  ;;  %v111_v29 = vld [vmem:[%s3100_s1 + $0x108] sm:$0xff] }
  0x3d   :  { %1366 = vmatprep.subr.bf16.mxu0 %v2332_v58  ;;  %1530 = vmatprep.subr.bf16.mxu1 %v2334_v60  ;;  %v2354_v49 = vcombine.high %v217_v40, %v219_v41  ;;  %v221_v50 = vunpack.c.h.s8.bf16 %v100_v42  ;;  %v223_v51 = vunpack.c.h.s8.bf16 %v101_v43  ;;  %v2351_v54 = vcombine.low %v216_v37, %v218_v39  ;;  %v113_v39 = vld [vmem:[%s3100_s1 + $0x118] sm:$0xff]  ;;  %v64_v42 = vld [vmem:[%s3099_s0] sm:$0xff] }
  0x3e   :  { %v2353_v55 = vcombine.low %v217_v40, %v219_v41  ;;  %v2356_v56 = vcombine.high %v220_v46, %v222_v47  ;;  %v224_v57 = vunpack.c.l.s8.bf16 %v102_v52  ;;  %v226_v59 = vunpack.c.l.s8.bf16 %v103_v53 }
  0x3f   :  { %v2358_v58 = vcombine.high %v221_v50, %v223_v51  ;;  %v225_v60 = vunpack.c.h.s8.bf16 %v102_v52  ;;  %v227_v61 = vunpack.c.h.s8.bf16 %v103_v53  ;;  %v2355_v0 = vcombine.low %v220_v46, %v222_v47  ;;  %v67_v52 = vld [vmem:[%s3099_s0 + $0x18] sm:$0xff] }
  0x40   :  { %1367 = vmatpush1.bf16.msra.mxu0 %v2331_v2  ;;  %1531 = vmatpush1.bf16.msra.mxu1 %v2333_v3  ;;  %v2357_v1 = vcombine.low %v221_v50, %v223_v51  ;;  %v228_v2 = vunpack.c.l.s8.bf16 %v104_v62  ;;  %v230_v3 = vunpack.c.l.s8.bf16 %v105_v63  ;;  %v2360_v4 = vcombine.high %v224_v57, %v226_v59  ;;  %v115_v50 = vld [vmem:[%s3100_s1 + $0x128] sm:$0xff] }
  0x41   :  { %1368 = vmatprep.subr.bf16.mxu0 %v2336_v6  ;;  %1532 = vmatprep.subr.bf16.mxu1 %v2338_v7  ;;  %v2362_v5 = vcombine.high %v225_v60, %v227_v61  ;;  %v229_v6 = vunpack.c.h.s8.bf16 %v104_v62  ;;  %v231_v7 = vunpack.c.h.s8.bf16 %v105_v63  ;;  %v2359_v10 = vcombine.low %v224_v57, %v226_v59  ;;  %v117_v62 = vld [vmem:[%s3100_s1 + $0x138] sm:$0xff] }
  0x42   :  { %v2361_v11 = vcombine.low %v225_v60, %v227_v61  ;;  %v234_v15 = vunpack.c.l.s8.bf16 %v107_v9  ;;  %v235_v17 = vunpack.c.h.s8.bf16 %v107_v9  ;;  %v2363_v20 = vcombine.low %v228_v2, %v230_v3  ;;  %v116_v61 = vld [vmem:[%s3100_s1 + $0x130] sm:$0xff]  ;;  %v119_v9 = vld [vmem:[%s3100_s1 + $0x148] sm:$0xff] }
  0x43   :  { %v2365_v21 = vcombine.low %v229_v6, %v231_v7  ;;  %v237_v26 = vunpack.c.h.s8.bf16 %v108_v18  ;;  %v243_v37 = vunpack.c.h.s8.bf16 %v111_v29  ;;  %v71_v51 = vpack.c.bf16 %v64_v42, %v64_v42 }
  0x44   :  { %1369 = vmatpush1.bf16.msra.mxu0 %v2335_v12  ;;  %1533 = vmatpush1.bf16.msra.mxu1 %v2337_v13  ;;  %v2364_v12 = vcombine.high %v228_v2, %v230_v3  ;;  %v232_v13 = vunpack.c.l.s8.bf16 %v106_v8  ;;  %v251_v60 = vunpack.c.h.s8.bf16 %v115_v50  ;;  %v74_v63 = vpack.c.bf16 %v67_v52, %v67_v52 }
  0x45   :  { %1370 = vmatprep.subr.bf16.mxu0 %v2340_v14  ;;  %1534 = vmatprep.subr.bf16.mxu1 %v2342_v16  ;;  %v2366_v14 = vcombine.high %v229_v6, %v231_v7  ;;  %v233_v16 = vunpack.c.h.s8.bf16 %v106_v8  ;;  %v252_v2 = vunpack.c.l.s8.bf16 %v116_v61  ;;  %v254_v3 = vunpack.c.l.s8.bf16 %v117_v62  ;;  %v118_v8 = vld [vmem:[%s3100_s1 + $0x140] sm:$0xff] }
  0x46   :  { %v2368_v24 = vcombine.high %v232_v13, %v234_v15  ;;  %v2367_v30 = vcombine.low %v232_v13, %v234_v15  ;;  %v258_v15 = vunpack.c.l.s8.bf16 %v119_v9 }
  0x47   :  { %v2370_v25 = vcombine.high %v233_v16, %v235_v17  ;;  %v2369_v31 = vcombine.low %v233_v16, %v235_v17  ;;  %v257_v16 = vunpack.c.h.s8.bf16 %v118_v8  ;;  %v259_v17 = vunpack.c.h.s8.bf16 %v119_v9 }
  0x48   :  { %1371 = vmatpush1.bf16.msra.mxu0 %v2339_v22  ;;  %1535 = vmatpush1.bf16.msra.mxu1 %v2341_v23  ;;  %v236_v22 = vunpack.c.l.s8.bf16 %v108_v18  ;;  %v238_v23 = vunpack.c.l.s8.bf16 %v109_v19  ;;  %v120_v18 = vld [vmem:[%s3100_s1 + $0x150] sm:$0xff] }
  0x49   :  { %1372 = vmatprep.subr.bf16.mxu0 %v2344_v27  ;;  %1536 = vmatprep.subr.bf16.mxu1 %v2346_v28  ;;  %v239_v27 = vunpack.c.h.s8.bf16 %v109_v19  ;;  %v110_v28 = vld [vmem:[%s3100_s1 + $0x100] sm:$0xff]  ;;  %v121_v19 = vld [vmem:[%s3100_s1 + $0x158] sm:$0xff] }
  0x4a   :  { %v2372_v32 = vcombine.high %v236_v22, %v238_v23  ;;  %v240_v33 = vunpack.c.l.s8.bf16 %v110_v28  ;;  %v2371_v40 = vcombine.low %v236_v22, %v238_v23  ;;  %v260_v22 = vunpack.c.l.s8.bf16 %v120_v18 }
  0x4b   :  { %v2373_v41 = vcombine.low %v237_v26, %v239_v27  ;;  %v262_v23 = vunpack.c.l.s8.bf16 %v121_v19 }
  0x4c   :  { %1373 = vmatpush1.bf16.msra.mxu0 %v2343_v34  ;;  %1537 = vmatpush1.bf16.msra.mxu1 %v2345_v35  ;;  %v2374_v34 = vcombine.high %v237_v26, %v239_v27  ;;  %v242_v35 = vunpack.c.l.s8.bf16 %v111_v29  ;;  %v2394_v27 = vcombine.high %v257_v16, %v259_v17  ;;  %v123_v29 = vld [vmem:[%s3100_s1 + $0x168] sm:$0xff] }
  0x4d   :  { %1374 = vmatprep.subr.bf16.mxu0 %v2348_v36  ;;  %1538 = vmatprep.subr.bf16.mxu1 %v2350_v38  ;;  %v241_v36 = vunpack.c.h.s8.bf16 %v110_v28  ;;  %v112_v38 = vld [vmem:[%s3100_s1 + $0x110] sm:$0xff]  ;;  %v122_v28 = vld [vmem:[%s3100_s1 + $0x160] sm:$0xff] }
  0x4e   :  { %v244_v43 = vunpack.c.l.s8.bf16 %v112_v38  ;;  %v245_v47 = vunpack.c.h.s8.bf16 %v112_v38  ;;  %v2375_v53 = vcombine.low %v240_v33, %v242_v35  ;;  %v124_v38 = vld [vmem:[%s3100_s1 + $0x170] sm:$0xff] }
  0x4f   :  { %v2378_v46 = vcombine.high %v241_v36, %v243_v37  ;;  %v268_v42 = vunpack.c.l.s8.bf16 %v124_v38 }
  0x50   :  { %1375 = vmatpush1.bf16.msra.mxu0 %v2347_v44  ;;  %1539 = vmatpush1.bf16.msra.mxu1 %v2349_v45  ;;  %v246_v44 = vunpack.c.l.s8.bf16 %v113_v39  ;;  %v2376_v45 = vcombine.high %v240_v33, %v242_v35  ;;  %v266_v35 = vunpack.c.l.s8.bf16 %v123_v29 }
  0x51   :  { %1376 = vmatprep.subr.bf16.mxu0 %v2352_v48  ;;  %1540 = vmatprep.subr.bf16.mxu1 %v2354_v49  ;;  %v247_v48 = vunpack.c.h.s8.bf16 %v113_v39  ;;  %v114_v49 = vld [vmem:[%s3100_s1 + $0x120] sm:$0xff]  ;;  %v125_v39 = vld [vmem:[%s3100_s1 + $0x178] sm:$0xff] }
  0x52   :  { %v249_v59 = vunpack.c.h.s8.bf16 %v114_v49 }
  0x53   :  { %v2382_v57 = vcombine.high %v245_v47, %v247_v48 }
  0x54   :  { %1377 = vmatpush1.bf16.msra.mxu0 %v2351_v54  ;;  %1541 = vmatpush1.bf16.msra.mxu1 %v2353_v55  ;;  %v2377_v54 = vcombine.low %v241_v36, %v243_v37  ;;  %v2380_v55 = vcombine.high %v244_v43, %v246_v44  ;;  %v2386_v7 = vcombine.high %v249_v59, %v251_v60  ;;  %v265_v36 = vunpack.c.h.s8.bf16 %v122_v28 }
  0x55   :  { %1378 = vmatprep.subr.bf16.mxu0 %v2356_v56  ;;  %1542 = vmatprep.subr.bf16.mxu1 %v2358_v58  ;;  %v248_v56 = vunpack.c.l.s8.bf16 %v114_v49  ;;  %v250_v58 = vunpack.c.l.s8.bf16 %v115_v50  ;;  %v267_v37 = vunpack.c.h.s8.bf16 %v123_v29  ;;  %v127_v49 = vld [vmem:[%s3100_s1 + $0x188] sm:$0xff] }
  0x57   :  { %v2384_v6 = vcombine.high %v248_v56, %v250_v58 }
  0x58   :  { %1379 = vmatpush1.bf16.msra.mxu0 %v2355_v0  ;;  %1543 = vmatpush1.bf16.msra.mxu1 %v2357_v1  ;;  %v2379_v0 = vcombine.low %v244_v43, %v246_v44  ;;  %v2381_v1 = vcombine.low %v245_v47, %v247_v48  ;;  %v270_v43 = vunpack.c.l.s8.bf16 %v125_v39  ;;  %v269_v44 = vunpack.c.h.s8.bf16 %v124_v38  ;;  %v126_v48 = vld [vmem:[%s3100_s1 + $0x180] sm:$0xff] }
  0x59   :  { %1380 = vmatprep.subr.bf16.mxu0 %v2360_v4  ;;  %1544 = vmatprep.subr.bf16.mxu1 %v2362_v5  ;;  %v253_v4 = vunpack.c.h.s8.bf16 %v116_v61  ;;  %v255_v5 = vunpack.c.h.s8.bf16 %v117_v62  ;;  %v2402_v47 = vcombine.high %v265_v36, %v267_v37 }
  0x5a   :  { %v2404_v52 = vcombine.high %v268_v42, %v270_v43 }
  0x5b   :  { %v2390_v13 = vcombine.high %v253_v4, %v255_v5 }
  0x5c   :  { %1381 = vmatpush1.bf16.msra.mxu0 %v2359_v10  ;;  %1545 = vmatpush1.bf16.msra.mxu1 %v2361_v11  ;;  %v2383_v10 = vcombine.low %v248_v56, %v250_v58  ;;  %v2385_v11 = vcombine.low %v249_v59, %v251_v60  ;;  %v273_v56 = vunpack.c.h.s8.bf16 %v126_v48  ;;  %v128_v58 = vld [vmem:[%s3100_s1 + $0x190] sm:$0xff]  ;;  %v129_v59 = vld [vmem:[%s3100_s1 + $0x198] sm:$0xff]  ;;  %v2403_v60 = vcombine.low %v268_v42, %v270_v43 }
  0x5d   :  { %1382 = vmatprep.subr.bf16.mxu0 %v2364_v12  ;;  %1546 = vmatprep.subr.bf16.mxu1 %v2366_v14  ;;  %v2388_v12 = vcombine.high %v252_v2, %v254_v3  ;;  %v256_v14 = vunpack.c.l.s8.bf16 %v118_v8  ;;  %v276_v62 = vunpack.c.l.s8.bf16 %v128_v58 }
  0x5f   :  { %v2392_v26 = vcombine.high %v256_v14, %v258_v15 }
  0x60   :  { %1383 = vmatpush1.bf16.msra.mxu0 %v2363_v20  ;;  %1547 = vmatpush1.bf16.msra.mxu1 %v2365_v21  ;;  %v2387_v20 = vcombine.low %v252_v2, %v254_v3  ;;  %v2389_v21 = vcombine.low %v253_v4, %v255_v5  ;;  %v130_v4 = vld [vmem:[%s3100_s1 + $0x1a0] sm:$0xff]  ;;  %v131_v5 = vld [vmem:[%s3100_s1 + $0x1a8] sm:$0xff] }
  0x61   :  { %1384 = vmatprep.subr.bf16.mxu0 %v2368_v24  ;;  %1548 = vmatprep.subr.bf16.mxu1 %v2370_v25  ;;  %v261_v24 = vunpack.c.h.s8.bf16 %v120_v18  ;;  %v263_v25 = vunpack.c.h.s8.bf16 %v121_v19 }
  0x63   :  { %v2398_v33 = vcombine.high %v261_v24, %v263_v25 }
  0x64   :  { %1385 = vmatpush1.bf16.msra.mxu0 %v2367_v30  ;;  %1549 = vmatpush1.bf16.msra.mxu1 %v2369_v31  ;;  %v2391_v30 = vcombine.low %v256_v14, %v258_v15  ;;  %v2393_v31 = vcombine.low %v257_v16, %v259_v17  ;;  %v132_v14 = vld [vmem:[%s3100_s1 + $0x1b0] sm:$0xff]  ;;  %v133_v15 = vld [vmem:[%s3100_s1 + $0x1b8] sm:$0xff] }
  0x65   :  { %1386 = vmatprep.subr.bf16.mxu0 %v2372_v32  ;;  %1550 = vmatprep.subr.bf16.mxu1 %v2374_v34  ;;  %v2396_v32 = vcombine.high %v260_v22, %v262_v23  ;;  %v264_v34 = vunpack.c.l.s8.bf16 %v122_v28  ;;  %v284_v18 = vunpack.c.l.s8.bf16 %v132_v14  ;;  %v286_v19 = vunpack.c.l.s8.bf16 %v133_v15 }
  0x67   :  { %v2399_v50 = vcombine.low %v264_v34, %v266_v35  ;;  %v2420_v28 = vcombine.high %v284_v18, %v286_v19 }
  0x68   :  { %1387 = vmatpush1.bf16.msra.mxu0 %v2371_v40  ;;  %1551 = vmatpush1.bf16.msra.mxu1 %v2373_v41  ;;  %v2395_v40 = vcombine.low %v260_v22, %v262_v23  ;;  %v2397_v41 = vcombine.low %v261_v24, %v263_v25  ;;  %v134_v24 = vld [vmem:[%s3100_s1 + $0x1c0] sm:$0xff]  ;;  %v135_v25 = vld [vmem:[%s3100_s1 + $0x1c8] sm:$0xff] }
  0x69   :  { %1397 = vmatprep.subr.bf16.mxu0 %v2376_v45  ;;  %1561 = vmatprep.subr.bf16.mxu1 %v2378_v46  ;;  %v271_v45 = vunpack.c.h.s8.bf16 %v125_v39  ;;  %v2400_v46 = vcombine.high %v264_v34, %v266_v35  ;;  %v136_v34 = vld [vmem:[%s3100_s1 + $0x1d0] sm:$0xff]  ;;  %v137_v35 = vld [vmem:[%s3100_s1 + $0x1d8] sm:$0xff] }
  0x6a   :  { %v292_v38 = vunpack.c.l.s8.bf16 %v136_v34  ;;  %v294_v39 = vunpack.c.l.s8.bf16 %v137_v35 }
  0x6b   :  { %1389 = vmatmul.mubr.bf16.vlgmr.msra.gmra.mrb[0].mxu0 %v71_v51  ;;  %1553 = vmatmul.mubr.bf16.vlgmr.msra.gmra.mrb[0].mxu1 %v71_v51  ;;  %v2401_v51 = vcombine.low %v265_v36, %v267_v37  ;;  %v2405_v61 = vcombine.low %v269_v44, %v271_v45  ;;  %v2419_v36 = vcombine.low %v284_v18, %v286_v19 }
  0x6c   :  { %1398 = vmatpush1.bf16.msra.mxu0 %v2375_v53  ;;  %1562 = vmatpush1.bf16.msra.mxu1 %v2377_v54  ;;  %v2406_v53 = vcombine.high %v269_v44, %v271_v45  ;;  %v272_v54 = vunpack.c.l.s8.bf16 %v126_v48  ;;  %v138_v44 = vld [vmem:[%s3100_s1 + $0x1e0] sm:$0xff]  ;;  %v139_v45 = vld [vmem:[%s3100_s1 + $0x1e8] sm:$0xff]  ;;  %v2428_v48 = vcombine.high %v292_v38, %v294_v39 }
  0x6d   :  { %1399 = vmatprep.subr.bf16.mxu0 %v2380_v55  ;;  %1563 = vmatprep.subr.bf16.mxu1 %v2382_v57  ;;  %v274_v55 = vunpack.c.l.s8.bf16 %v127_v49  ;;  %v275_v57 = vunpack.c.h.s8.bf16 %v127_v49 }
  0x6e   :  { %1429 = vmatprep.mubr.bf16.mxu0 %v74_v63  ;;  %1593 = vmatprep.mubr.bf16.mxu1 %v74_v63  ;;  %v278_v63 = vunpack.c.l.s8.bf16 %v129_v59 }
  0x6f   :  { %v2408_v2 = vcombine.high %v272_v54, %v274_v55  ;;  %v2410_v3 = vcombine.high %v273_v56, %v275_v57 }
  0x70   :  { %1400 = vmatpush1.bf16.msra.mxu0 %v2379_v0  ;;  %1564 = vmatpush1.bf16.msra.mxu1 %v2381_v1  ;;  %v277_v0 = vunpack.c.h.s8.bf16 %v128_v58  ;;  %v279_v1 = vunpack.c.h.s8.bf16 %v129_v59  ;;  %v2412_v8 = vcombine.high %v276_v62, %v278_v63  ;;  %v2411_v16 = vcombine.low %v276_v62, %v278_v63 }
  0x71   :  { %1401 = vmatprep.subr.bf16.mxu0 %v2384_v6  ;;  %1565 = vmatprep.subr.bf16.mxu1 %v2386_v7  ;;  %v2407_v6 = vcombine.low %v272_v54, %v274_v55  ;;  %v2409_v7 = vcombine.low %v273_v56, %v275_v57  ;;  %v140_v54 = vld [vmem:[%s3100_s1 + $0x1f0] sm:$0xff]  ;;  %v141_v55 = vld [vmem:[%s3100_s1 + $0x1f8] sm:$0xff]  ;;  %v2427_v56 = vcombine.low %v292_v38, %v294_v39 }
  0x72   :  { %v2414_v9 = vcombine.high %v277_v0, %v279_v1  ;;  %v2413_v17 = vcombine.low %v277_v0, %v279_v1  ;;  %v300_v58 = vunpack.c.l.s8.bf16 %v140_v54  ;;  %v302_v59 = vunpack.c.l.s8.bf16 %v141_v55  ;;  %v142_v0 = vld [vmem:[%s3100_s1 + $0x200] sm:$0xff]  ;;  %v143_v1 = vld [vmem:[%s3100_s1 + $0x208] sm:$0xff] }
  0x74   :  { %1402 = vmatpush1.bf16.msra.mxu0 %v2383_v10  ;;  %1566 = vmatpush1.bf16.msra.mxu1 %v2385_v11  ;;  %v280_v10 = vunpack.c.l.s8.bf16 %v130_v4  ;;  %v282_v11 = vunpack.c.l.s8.bf16 %v131_v5 }
  0x75   :  { %1403 = vmatprep.subr.bf16.mxu0 %v2388_v12  ;;  %1567 = vmatprep.subr.bf16.mxu1 %v2390_v13  ;;  %v281_v12 = vunpack.c.h.s8.bf16 %v130_v4  ;;  %v283_v13 = vunpack.c.h.s8.bf16 %v131_v5  ;;  %v2436_v4 = vcombine.high %v300_v58, %v302_v59 }
  0x76   :  { %v2416_v22 = vcombine.high %v280_v10, %v282_v11 }
  0x77   :  { %v2418_v23 = vcombine.high %v281_v12, %v283_v13 }
  0x78   :  { %1404 = vmatpush1.bf16.msra.mxu0 %v2387_v20  ;;  %1568 = vmatpush1.bf16.msra.mxu1 %v2389_v21  ;;  %v285_v20 = vunpack.c.h.s8.bf16 %v132_v14  ;;  %v287_v21 = vunpack.c.h.s8.bf16 %v133_v15  ;;  %v66_v14 = vld [vmem:[%s3099_s0 + $0x10] sm:$0xff] }
  0x79   :  { %1405 = vmatprep.subr.bf16.mxu0 %v2392_v26  ;;  %1569 = vmatprep.subr.bf16.mxu1 %v2394_v27  ;;  %v2415_v26 = vcombine.low %v280_v10, %v282_v11  ;;  %v2417_v27 = vcombine.low %v281_v12, %v283_v13  ;;  %v144_v10 = vld [vmem:[%s3100_s1 + $0x210] sm:$0xff]  ;;  %v145_v11 = vld [vmem:[%s3100_s1 + $0x218] sm:$0xff]  ;;  %v2435_v12 = vcombine.low %v300_v58, %v302_v59 }
  0x7a   :  { %v2422_v29 = vcombine.high %v285_v20, %v287_v21  ;;  %v2421_v37 = vcombine.low %v285_v20, %v287_v21  ;;  %v308_v15 = vunpack.c.l.s8.bf16 %v144_v10  ;;  %v311_v18 = vunpack.c.h.s8.bf16 %v145_v11  ;;  %v146_v21 = vld [vmem:[%s3100_s1 + $0x220] sm:$0xff] }
  0x7c   :  { %1406 = vmatpush1.bf16.msra.mxu0 %v2391_v30  ;;  %1570 = vmatpush1.bf16.msra.mxu1 %v2393_v31  ;;  %v288_v30 = vunpack.c.l.s8.bf16 %v134_v24  ;;  %v290_v31 = vunpack.c.l.s8.bf16 %v135_v25 }
  0x7d   :  { %1407 = vmatprep.subr.bf16.mxu0 %v2396_v32  ;;  %1571 = vmatprep.subr.bf16.mxu1 %v2398_v33  ;;  %v289_v32 = vunpack.c.h.s8.bf16 %v134_v24  ;;  %v291_v33 = vunpack.c.h.s8.bf16 %v135_v25  ;;  %v69_v25 = vld [vmem:[%s3099_s0 + $0x28] sm:$0xff] }
  0x7e   :  { %v2424_v42 = vcombine.high %v288_v30, %v290_v31 }
  0x7f   :  { %v2426_v43 = vcombine.high %v289_v32, %v291_v33 }
  0x80   :  { %1408 = vmatpush1.bf16.msra.mxu0 %v2395_v40  ;;  %1572 = vmatpush1.bf16.msra.mxu1 %v2397_v41  ;;  %v293_v40 = vunpack.c.h.s8.bf16 %v136_v34  ;;  %v295_v41 = vunpack.c.h.s8.bf16 %v137_v35  ;;  %v149_v34 = vld [vmem:[%s3100_s1 + $0x238] sm:$0xff]  ;;  %v76_v35 = vpack.c.bf16 %v69_v25, %v69_v25 }
  0x81   :  { %1409 = vmatprep.subr.bf16.mxu0 %v2400_v46  ;;  %1573 = vmatprep.subr.bf16.mxu1 %v2402_v47  ;;  %v2423_v46 = vcombine.low %v288_v30, %v290_v31  ;;  %v2425_v47 = vcombine.low %v289_v32, %v291_v33  ;;  %v313_v31 = vunpack.c.h.s8.bf16 %v146_v21  ;;  %v148_v33 = vld [vmem:[%s3100_s1 + $0x230] sm:$0xff]  ;;  %v318_v39 = vunpack.c.l.s8.bf16 %v149_v34 }
  0x82   :  { %v2430_v49 = vcombine.high %v293_v40, %v295_v41  ;;  %v2429_v57 = vcombine.low %v293_v40, %v295_v41  ;;  %v316_v38 = vunpack.c.l.s8.bf16 %v148_v33 }
  0x84   :  { %1410 = vmatpush1.bf16.msra.mxu0 %v2399_v50  ;;  %1574 = vmatpush1.bf16.msra.mxu1 %v2401_v51  ;;  %v296_v50 = vunpack.c.l.s8.bf16 %v138_v44  ;;  %v298_v51 = vunpack.c.l.s8.bf16 %v139_v45 }
  0x85   :  { %1411 = vmatprep.subr.bf16.mxu0 %v2404_v52  ;;  %1575 = vmatprep.subr.bf16.mxu1 %v2406_v53  ;;  %v297_v52 = vunpack.c.h.s8.bf16 %v138_v44  ;;  %v299_v53 = vunpack.c.h.s8.bf16 %v139_v45  ;;  %v150_v44 = vld [vmem:[%s3100_s1 + $0x240] sm:$0xff]  ;;  %v151_v45 = vld [vmem:[%s3100_s1 + $0x248] sm:$0xff] }
  0x86   :  { %v2432_v62 = vcombine.high %v296_v50, %v298_v51 }
  0x87   :  { %v2434_v63 = vcombine.high %v297_v52, %v299_v53 }
  0x88   :  { %1412 = vmatpush1.bf16.msra.mxu0 %v2403_v60  ;;  %1576 = vmatpush1.bf16.msra.mxu1 %v2405_v61  ;;  %v301_v60 = vunpack.c.h.s8.bf16 %v140_v54  ;;  %v303_v61 = vunpack.c.h.s8.bf16 %v141_v55  ;;  %v152_v54 = vld [vmem:[%s3100_s1 + $0x250] sm:$0xff]  ;;  %v153_v55 = vld [vmem:[%s3100_s1 + $0x258] sm:$0xff] }
  0x89   :  { %1413 = vmatprep.subr.bf16.mxu0 %v2408_v2  ;;  %1577 = vmatprep.subr.bf16.mxu1 %v2410_v3  ;;  %v2431_v2 = vcombine.low %v296_v50, %v298_v51  ;;  %v2433_v3 = vcombine.low %v297_v52, %v299_v53  ;;  %v322_v51 = vunpack.c.l.s8.bf16 %v151_v45  ;;  %v321_v52 = vunpack.c.h.s8.bf16 %v150_v44 }
  0x8a   :  { %v2438_v5 = vcombine.high %v301_v60, %v303_v61  ;;  %v2437_v13 = vcombine.low %v301_v60, %v303_v61  ;;  %v323_v53 = vunpack.c.h.s8.bf16 %v151_v45  ;;  %v324_v58 = vunpack.c.l.s8.bf16 %v152_v54 }
  0x8b   :  { %v326_v59 = vunpack.c.l.s8.bf16 %v153_v55  ;;  %v325_v60 = vunpack.c.h.s8.bf16 %v152_v54  ;;  %v327_v61 = vunpack.c.h.s8.bf16 %v153_v55 }
  0x8c   :  { %1414 = vmatpush1.bf16.msra.mxu0 %v2407_v6  ;;  %1578 = vmatpush1.bf16.msra.mxu1 %v2409_v7  ;;  %v304_v6 = vunpack.c.l.s8.bf16 %v142_v0  ;;  %v306_v7 = vunpack.c.l.s8.bf16 %v143_v1 }
  0x8d   :  { %1415 = vmatprep.subr.bf16.mxu0 %v2412_v8  ;;  %1579 = vmatprep.subr.bf16.mxu1 %v2414_v9  ;;  %v305_v8 = vunpack.c.h.s8.bf16 %v142_v0  ;;  %v307_v9 = vunpack.c.h.s8.bf16 %v143_v1  ;;  %v154_v0 = vld [vmem:[%s3100_s1 + $0x260] sm:$0xff]  ;;  %v155_v1 = vld [vmem:[%s3100_s1 + $0x268] sm:$0xff] }
  0x8e   :  { %v2440_v19 = vcombine.high %v304_v6, %v306_v7  ;;  %v2439_v24 = vcombine.low %v304_v6, %v306_v7  ;;  %v328_v6 = vunpack.c.l.s8.bf16 %v154_v0  ;;  %v330_v7 = vunpack.c.l.s8.bf16 %v155_v1 }
  0x8f   :  { %v2442_v20 = vcombine.high %v305_v8, %v307_v9 }
  0x90   :  { %1416 = vmatpush1.bf16.msra.mxu0 %v2411_v16  ;;  %1580 = vmatpush1.bf16.msra.mxu1 %v2413_v17  ;;  %v310_v16 = vunpack.c.l.s8.bf16 %v145_v11  ;;  %v309_v17 = vunpack.c.h.s8.bf16 %v144_v10  ;;  %v156_v10 = vld [vmem:[%s3100_s1 + $0x270] sm:$0xff]  ;;  %v157_v11 = vld [vmem:[%s3100_s1 + $0x278] sm:$0xff] }
  0x91   :  { %1417 = vmatprep.subr.bf16.mxu0 %v2416_v22  ;;  %1581 = vmatprep.subr.bf16.mxu1 %v2418_v23  ;;  %v147_v22 = vld [vmem:[%s3100_s1 + $0x228] sm:$0xff]  ;;  %v73_v23 = vpack.c.bf16 %v66_v14, %v66_v14  ;;  %v332_v14 = vunpack.c.l.s8.bf16 %v156_v10 }
  0x92   :  { %v314_v30 = vunpack.c.l.s8.bf16 %v147_v22  ;;  %v315_v32 = vunpack.c.h.s8.bf16 %v147_v22  ;;  %v2463_v22 = vcombine.low %v328_v6, %v330_v7 }
  0x94   :  { %1418 = vmatpush1.bf16.msra.mxu0 %v2415_v26  ;;  %1582 = vmatpush1.bf16.msra.mxu1 %v2417_v27  ;;  %v2441_v26 = vcombine.low %v305_v8, %v307_v9  ;;  %v2444_v27 = vcombine.high %v308_v15, %v310_v16  ;;  %v2450_v41 = vcombine.high %v313_v31, %v315_v32  ;;  %v329_v8 = vunpack.c.h.s8.bf16 %v154_v0 }
  0x95   :  { %1419 = vmatprep.subr.bf16.mxu0 %v2420_v28  ;;  %1583 = vmatprep.subr.bf16.mxu1 %v2422_v29  ;;  %v2446_v28 = vcombine.high %v309_v17, %v311_v18  ;;  %v312_v29 = vunpack.c.l.s8.bf16 %v146_v21  ;;  %v331_v9 = vunpack.c.h.s8.bf16 %v155_v1  ;;  %v159_v21 = vld [vmem:[%s3100_s1 + $0x288] sm:$0xff] }
  0x97   :  { %v2448_v40 = vcombine.high %v312_v29, %v314_v30 }
  0x98   :  { %1420 = vmatpush1.bf16.msra.mxu0 %v2419_v36  ;;  %1584 = vmatpush1.bf16.msra.mxu1 %v2421_v37  ;;  %v2443_v36 = vcombine.low %v308_v15, %v310_v16  ;;  %v2445_v37 = vcombine.low %v309_v17, %v311_v18  ;;  %v334_v15 = vunpack.c.l.s8.bf16 %v157_v11  ;;  %v333_v16 = vunpack.c.h.s8.bf16 %v156_v10 }
  0x99   :  { %1421 = vmatprep.subr.bf16.mxu0 %v2424_v42  ;;  %1585 = vmatprep.subr.bf16.mxu1 %v2426_v43  ;;  %v317_v42 = vunpack.c.h.s8.bf16 %v148_v33  ;;  %v319_v43 = vunpack.c.h.s8.bf16 %v149_v34  ;;  %v335_v17 = vunpack.c.h.s8.bf16 %v157_v11  ;;  %v2464_v18 = vcombine.high %v328_v6, %v330_v7  ;;  %v168_v6 = vld [vmem:[%s3100_s1 + $0x2d0] sm:$0xff]  ;;  %v169_v7 = vld [vmem:[%s3100_s1 + $0x2d8] sm:$0xff] }
  0x9a   :  { %v356_v10 = vunpack.c.l.s8.bf16 %v168_v6  ;;  %v358_v11 = vunpack.c.l.s8.bf16 %v169_v7 }
  0x9b   :  { %v2454_v50 = vcombine.high %v317_v42, %v319_v43  ;;  %v2470_v25 = vcombine.high %v333_v16, %v335_v17  ;;  %v2469_v33 = vcombine.low %v333_v16, %v335_v17  ;;  %v170_v16 = vld [vmem:[%s3100_s1 + $0x2e0] sm:$0xff]  ;;  %v171_v17 = vld [vmem:[%s3100_s1 + $0x2e8] sm:$0xff] }
  0x9c   :  { %1422 = vmatpush1.bf16.msra.mxu0 %v2423_v46  ;;  %1586 = vmatpush1.bf16.msra.mxu1 %v2425_v47  ;;  %v2447_v46 = vcombine.low %v312_v29, %v314_v30  ;;  %v2449_v47 = vcombine.low %v313_v31, %v315_v32  ;;  %v339_v29 = vunpack.c.h.s8.bf16 %v159_v21  ;;  %v160_v30 = vld [vmem:[%s3100_s1 + $0x290] sm:$0xff]  ;;  %v161_v31 = vld [vmem:[%s3100_s1 + $0x298] sm:$0xff]  ;;  %v2467_v32 = vcombine.low %v332_v14, %v334_v15 }
  0x9d   :  { %1423 = vmatprep.subr.bf16.mxu0 %v2428_v48  ;;  %1587 = vmatprep.subr.bf16.mxu1 %v2430_v49  ;;  %v2452_v48 = vcombine.high %v316_v38, %v318_v39  ;;  %v320_v49 = vunpack.c.l.s8.bf16 %v150_v44  ;;  %v340_v34 = vunpack.c.l.s8.bf16 %v160_v30 }
  0xa0   :  { %1424 = vmatpush1.bf16.msra.mxu0 %v2427_v56  ;;  %1588 = vmatpush1.bf16.msra.mxu1 %v2429_v57  ;;  %v2451_v56 = vcombine.low %v316_v38, %v318_v39  ;;  %v2453_v57 = vcombine.low %v317_v42, %v319_v43 }
  0xa1   :  { %1425 = vmatprep.subr.bf16.mxu0 %v2432_v62  ;;  %1589 = vmatprep.subr.bf16.mxu1 %v2434_v63  ;;  %v2456_v62 = vcombine.high %v320_v49, %v322_v51  ;;  %v2458_v63 = vcombine.high %v321_v52, %v323_v53 }
  0xa4   :  { %1426 = vmatpush1.bf16.msra.mxu0 %v2431_v2  ;;  %1590 = vmatpush1.bf16.msra.mxu1 %v2433_v3  ;;  %v2455_v2 = vcombine.low %v320_v49, %v322_v51  ;;  %v2457_v3 = vcombine.low %v321_v52, %v323_v53  ;;  %v165_v51 = vld [vmem:[%s3100_s1 + $0x2b8] sm:$0xff] }
  0xa5   :  { %1427 = vmatprep.subr.bf16.mxu0 %v2436_v4  ;;  %1591 = vmatprep.subr.bf16.mxu1 %v2438_v5  ;;  %v2460_v4 = vcombine.high %v324_v58, %v326_v59  ;;  %v2462_v5 = vcombine.high %v325_v60, %v327_v61  ;;  %v350_v55 = vunpack.c.l.s8.bf16 %v165_v51 }
  0xa8   :  { %1428 = vmatpush1.bf16.msra.mxu0 %v2435_v12  ;;  %1592 = vmatpush1.bf16.msra.mxu1 %v2437_v13  ;;  %v2459_v12 = vcombine.low %v324_v58, %v326_v59  ;;  %v2461_v13 = vcombine.low %v325_v60, %v327_v61  ;;  %v166_v60 = vld [vmem:[%s3100_s1 + $0x2c0] sm:$0xff]  ;;  %v167_v61 = vld [vmem:[%s3100_s1 + $0x2c8] sm:$0xff] }
  0xa9   :  { %1438 = vmatprep.subr.bf16.mxu0 %v2440_v19  ;;  %1602 = vmatprep.subr.bf16.mxu1 %v2442_v20  ;;  %v2466_v19 = vcombine.high %v329_v8, %v331_v9  ;;  %v158_v20 = vld [vmem:[%s3100_s1 + $0x280] sm:$0xff] }
  0xab   :  { %1430 = vmatmul.mubr.bf16.vlgmr.msra.gmra.mrb[0].mxu0 %v73_v23  ;;  %1594 = vmatmul.mubr.bf16.vlgmr.msra.gmra.mrb[0].mxu1 %v73_v23  ;;  %v2465_v23 = vcombine.low %v329_v8, %v331_v9 }
  0xac   :  { %1439 = vmatpush1.bf16.msra.mxu0 %v2439_v24  ;;  %1603 = vmatpush1.bf16.msra.mxu1 %v2441_v26  ;;  %v2468_v24 = vcombine.high %v332_v14, %v334_v15  ;;  %v336_v26 = vunpack.c.l.s8.bf16 %v158_v20 }
  0xad   :  { %1440 = vmatprep.subr.bf16.mxu0 %v2444_v27  ;;  %1604 = vmatprep.subr.bf16.mxu1 %v2446_v28  ;;  %v338_v27 = vunpack.c.l.s8.bf16 %v159_v21  ;;  %v337_v28 = vunpack.c.h.s8.bf16 %v158_v20  ;;  %v2492_v20 = vcombine.high %v356_v10, %v358_v11 }
  0xae   :  { %1470 = vmatprep.mubr.bf16.mxu0 %v76_v35  ;;  %1634 = vmatprep.mubr.bf16.mxu1 %v76_v35  ;;  %v342_v35 = vunpack.c.l.s8.bf16 %v161_v31 }
  0xaf   :  { %v2472_v38 = vcombine.high %v336_v26, %v338_v27  ;;  %v2474_v39 = vcombine.high %v337_v28, %v339_v29  ;;  %v2471_v42 = vcombine.low %v336_v26, %v338_v27  ;;  %v2473_v43 = vcombine.low %v337_v28, %v339_v29  ;;  %v172_v26 = vld [vmem:[%s3100_s1 + $0x2f0] sm:$0xff]  ;;  %v173_v27 = vld [vmem:[%s3100_s1 + $0x2f8] sm:$0xff] }
  0xb0   :  { %1441 = vmatpush1.bf16.msra.mxu0 %v2443_v36  ;;  %1605 = vmatpush1.bf16.msra.mxu1 %v2445_v37  ;;  %v341_v36 = vunpack.c.h.s8.bf16 %v160_v30  ;;  %v343_v37 = vunpack.c.h.s8.bf16 %v161_v31  ;;  %v2476_v44 = vcombine.high %v340_v34, %v342_v35  ;;  %v2475_v52 = vcombine.low %v340_v34, %v342_v35 }
  0xb1   :  { %1442 = vmatprep.subr.bf16.mxu0 %v2448_v40  ;;  %1606 = vmatprep.subr.bf16.mxu1 %v2450_v41  ;;  %v162_v40 = vld [vmem:[%s3100_s1 + $0x2a0] sm:$0xff]  ;;  %v163_v41 = vld [vmem:[%s3100_s1 + $0x2a8] sm:$0xff]  ;;  %v2491_v28 = vcombine.low %v356_v10, %v358_v11  ;;  %v364_v30 = vunpack.c.l.s8.bf16 %v172_v26  ;;  %v366_v31 = vunpack.c.l.s8.bf16 %v173_v27  ;;  %v1750_v10 = vld [vmem:[#allocation2 + $0x30] sm:$0xff] }
  0xb2   :  { %v2478_v45 = vcombine.high %v341_v36, %v343_v37  ;;  %v347_v49 = vunpack.c.h.s8.bf16 %v163_v41  ;;  %v2477_v53 = vcombine.low %v341_v36, %v343_v37  ;;  %v174_v36 = vld [vmem:[%s3100_s1 + $0x300] sm:$0xff]  ;;  %v175_v37 = vld [vmem:[%s3100_s1 + $0x308] sm:$0xff] }
  0xb4   :  { %1443 = vmatpush1.bf16.msra.mxu0 %v2447_v46  ;;  %1607 = vmatpush1.bf16.msra.mxu1 %v2449_v47  ;;  %v344_v46 = vunpack.c.l.s8.bf16 %v162_v40  ;;  %v346_v47 = vunpack.c.l.s8.bf16 %v163_v41 }
  0xb5   :  { %1444 = vmatprep.subr.bf16.mxu0 %v2452_v48  ;;  %1608 = vmatprep.subr.bf16.mxu1 %v2454_v50  ;;  %v345_v48 = vunpack.c.h.s8.bf16 %v162_v40  ;;  %v164_v50 = vld [vmem:[%s3100_s1 + $0x2b0] sm:$0xff]  ;;  %v2500_v40 = vcombine.high %v364_v30, %v366_v31 }
  0xb6   :  { %v348_v54 = vunpack.c.l.s8.bf16 %v164_v50  ;;  %v2480_v58 = vcombine.high %v344_v46, %v346_v47 }
  0xb7   :  { %v2482_v59 = vcombine.high %v345_v48, %v347_v49 }
  0xb8   :  { %1445 = vmatpush1.bf16.msra.mxu0 %v2451_v56  ;;  %1609 = vmatpush1.bf16.msra.mxu1 %v2453_v57  ;;  %v349_v56 = vunpack.c.h.s8.bf16 %v164_v50  ;;  %v351_v57 = vunpack.c.h.s8.bf16 %v165_v51  ;;  %v2484_v0 = vcombine.high %v348_v54, %v350_v55  ;;  %v2483_v8 = vcombine.low %v348_v54, %v350_v55 }
  0xb9   :  { %1446 = vmatprep.subr.bf16.mxu0 %v2456_v62  ;;  %1610 = vmatprep.subr.bf16.mxu1 %v2458_v63  ;;  %v2479_v62 = vcombine.low %v344_v46, %v346_v47  ;;  %v2481_v63 = vcombine.low %v345_v48, %v347_v49  ;;  %v2499_v46 = vcombine.low %v364_v30, %v366_v31  ;;  %v68_v48 = vld [vmem:[%s3099_s0 + $0x20] sm:$0xff] }
  0xba   :  { %v2486_v1 = vcombine.high %v349_v56, %v351_v57  ;;  %v2485_v9 = vcombine.low %v349_v56, %v351_v57  ;;  %v75_v51 = vpack.c.bf16 %v68_v48, %v68_v48 }
  0xbc   :  { %1447 = vmatpush1.bf16.msra.mxu0 %v2455_v2  ;;  %1611 = vmatpush1.bf16.msra.mxu1 %v2457_v3  ;;  %v352_v2 = vunpack.c.l.s8.bf16 %v166_v60  ;;  %v354_v3 = vunpack.c.l.s8.bf16 %v167_v61 }
  0xbd   :  { %1448 = vmatprep.subr.bf16.mxu0 %v2460_v4  ;;  %1612 = vmatprep.subr.bf16.mxu1 %v2462_v5  ;;  %v353_v4 = vunpack.c.h.s8.bf16 %v166_v60  ;;  %v355_v5 = vunpack.c.h.s8.bf16 %v167_v61  ;;  %v1744_v60 = vld [vmem:[#allocation2] sm:$0xff]  ;;  %v1746_v61 = vld [vmem:[#allocation2 + $0x10] sm:$0xff] }
  0xbe   :  { %v2488_v14 = vcombine.high %v352_v2, %v354_v3 }
  0xbf   :  { %v2490_v15 = vcombine.high %v353_v4, %v355_v5 }
  0xc0   :  { %1449 = vmatpush1.bf16.msra.mxu0 %v2459_v12  ;;  %1613 = vmatpush1.bf16.msra.mxu1 %v2461_v13  ;;  %v357_v12 = vunpack.c.h.s8.bf16 %v168_v6  ;;  %v359_v13 = vunpack.c.h.s8.bf16 %v169_v7  ;;  %v1814_v6 = vunpack.c.h.s8.bf16 %v1746_v61 }
  0xc1   :  { %1450 = vmatprep.subr.bf16.mxu0 %v2464_v18  ;;  %1614 = vmatprep.subr.bf16.mxu1 %v2466_v19  ;;  %v2487_v18 = vcombine.low %v352_v2, %v354_v3  ;;  %v2489_v19 = vcombine.low %v353_v4, %v355_v5  ;;  %v1749_v3 = vld [vmem:[#allocation2 + $0x28] sm:$0xff]  ;;  %v1751_v4 = vld [vmem:[#allocation2 + $0x38] sm:$0xff]  ;;  %v1812_v5 = vunpack.c.h.s8.bf16 %v1744_v60 }
  0xc2   :  { %v2494_v21 = vcombine.high %v357_v12, %v359_v13  ;;  %v2493_v29 = vcombine.low %v357_v12, %v359_v13  ;;  %v1817_v7 = vunpack.c.l.s8.bf16 %v1749_v3  ;;  %v1818_v12 = vunpack.c.l.s8.bf16 %v1750_v10 }
  0xc3   :  { %v1821_v13 = vunpack.c.h.s8.bf16 %v1749_v3 }
  0xc4   :  { %1451 = vmatpush1.bf16.msra.mxu0 %v2463_v22  ;;  %1615 = vmatpush1.bf16.msra.mxu1 %v2465_v23  ;;  %v360_v22 = vunpack.c.l.s8.bf16 %v170_v16  ;;  %v362_v23 = vunpack.c.l.s8.bf16 %v171_v17 }
  0xc5   :  { %1452 = vmatprep.subr.bf16.mxu0 %v2468_v24  ;;  %1616 = vmatprep.subr.bf16.mxu1 %v2470_v25  ;;  %v361_v24 = vunpack.c.h.s8.bf16 %v170_v16  ;;  %v363_v25 = vunpack.c.h.s8.bf16 %v171_v17  ;;  %v1755_v16 = vld [vmem:[#allocation2 + $0x58] sm:$0xff] }
  0xc6   :  { %v2496_v34 = vcombine.high %v360_v22, %v362_v23 }
  0xc7   :  { %v2498_v35 = vcombine.high %v361_v24, %v363_v25 }
  0xc8   :  { %1453 = vmatpush1.bf16.msra.mxu0 %v2467_v32  ;;  %1617 = vmatpush1.bf16.msra.mxu1 %v2469_v33  ;;  %v365_v32 = vunpack.c.h.s8.bf16 %v172_v26  ;;  %v367_v33 = vunpack.c.h.s8.bf16 %v173_v27  ;;  %v1831_v26 = vunpack.c.h.s8.bf16 %v1755_v16  ;;  %v1757_v27 = vld [vmem:[#allocation2 + $0x68] sm:$0xff] }
  0xc9   :  { %1454 = vmatprep.subr.bf16.mxu0 %v2472_v38  ;;  %1618 = vmatprep.subr.bf16.mxu1 %v2474_v39  ;;  %v2495_v38 = vcombine.low %v360_v22, %v362_v23  ;;  %v2497_v39 = vcombine.low %v361_v24, %v363_v25  ;;  %v1754_v22 = vld [vmem:[#allocation2 + $0x50] sm:$0xff]  ;;  %v1833_v31 = vunpack.c.l.s8.bf16 %v1757_v27 }
  0xca   :  { %v2502_v41 = vcombine.high %v365_v32, %v367_v33  ;;  %v2501_v47 = vcombine.low %v365_v32, %v367_v33  ;;  %v1826_v24 = vunpack.c.l.s8.bf16 %v1754_v22  ;;  %v1830_v30 = vunpack.c.h.s8.bf16 %v1754_v22  ;;  %v1756_v33 = vld [vmem:[#allocation2 + $0x60] sm:$0xff] }
  0xcc   :  { %1455 = vmatpush1.bf16.msra.mxu0 %v2471_v42  ;;  %1619 = vmatpush1.bf16.msra.mxu1 %v2473_v43  ;;  %v368_v42 = vunpack.c.l.s8.bf16 %v174_v36  ;;  %v370_v43 = vunpack.c.l.s8.bf16 %v175_v37 }
  0xcd   :  { %1456 = vmatprep.subr.bf16.mxu0 %v2476_v44  ;;  %1620 = vmatprep.subr.bf16.mxu1 %v2478_v45  ;;  %v369_v44 = vunpack.c.h.s8.bf16 %v174_v36  ;;  %v371_v45 = vunpack.c.h.s8.bf16 %v175_v37  ;;  %v1837_v37 = vunpack.c.h.s8.bf16 %v1757_v27 }
  0xce   :  { %v2504_v49 = vcombine.high %v368_v42, %v370_v43  ;;  %v2503_v54 = vcombine.low %v368_v42, %v370_v43 }
  0xcf   :  { %v2506_v50 = vcombine.high %v369_v44, %v371_v45  ;;  %v2505_v55 = vcombine.low %v369_v44, %v371_v45  ;;  %v1760_v45 = vld [vmem:[#allocation2 + $0x80] sm:$0xff] }
  0xd0   :  { %1457 = vmatpush1.bf16.msra.mxu0 %v2475_v52  ;;  %1621 = vmatpush1.bf16.msra.mxu1 %v2477_v53  ;;  %v1745_v52 = vld [vmem:[#allocation2 + $0x8] sm:$0xff]  ;;  %v1747_v53 = vld [vmem:[#allocation2 + $0x18] sm:$0xff] }
  0xd1   :  { %1458 = vmatprep.subr.bf16.mxu0 %v2480_v58  ;;  %1622 = vmatprep.subr.bf16.mxu1 %v2482_v59  ;;  %v1809_v56 = vunpack.c.l.s8.bf16 %v1745_v52  ;;  %v1811_v57 = vunpack.c.l.s8.bf16 %v1747_v53  ;;  %v2648_v58 = vmov 0   ;;  %v70_v59 = vld [vmem:[%s3099_s0 + $0x30] sm:$0xff]  ;;  %v1815_v2 = vunpack.c.h.s8.bf16 %v1747_v53 }
  0xd2   :  { %v1844_v53 = vunpack.c.h.s8.bf16 %v1760_v45 }
  0xd4   :  { %1459 = vmatpush1.bf16.msra.mxu0 %v2479_v62  ;;  %1623 = vmatpush1.bf16.msra.mxu1 %v2481_v63  ;;  %v77_v62 = vpack.c.bf16 %v70_v59, %v70_v59  ;;  %v1808_v63 = vunpack.c.l.s8.bf16 %v1744_v60 }
  0xd5   :  { %1460 = vmatprep.subr.bf16.mxu0 %v2484_v0  ;;  %1624 = vmatprep.subr.bf16.mxu1 %v2486_v1  ;;  %v1810_v0 = vunpack.c.l.s8.bf16 %v1746_v61  ;;  %v1813_v1 = vunpack.c.h.s8.bf16 %v1745_v52  ;;  %v1767_v52 = vld [vmem:[#allocation2 + $0xb8] sm:$0xff] }
  0xd8   :  { %1461 = vmatpush1.bf16.msra.mxu0 %v2483_v8  ;;  %1625 = vmatpush1.bf16.msra.mxu1 %v2485_v9  ;;  %v1819_v8 = vunpack.c.l.s8.bf16 %v1751_v4  ;;  %v1748_v9 = vld [vmem:[#allocation2 + $0x20] sm:$0xff] }
  0xd9   :  { %1462 = vmatprep.subr.bf16.mxu0 %v2488_v14  ;;  %1626 = vmatprep.subr.bf16.mxu1 %v2490_v15  ;;  %v1816_v11 = vunpack.c.l.s8.bf16 %v1748_v9  ;;  %v1823_v14 = vunpack.c.h.s8.bf16 %v1751_v4  ;;  %v1753_v15 = vld [vmem:[#allocation2 + $0x48] sm:$0xff]  ;;  %v1820_v17 = vunpack.c.h.s8.bf16 %v1748_v9 }
  0xda   :  { %v1829_v25 = vunpack.c.h.s8.bf16 %v1753_v15 }
  0xdc   :  { %1463 = vmatpush1.bf16.msra.mxu0 %v2487_v18  ;;  %1627 = vmatpush1.bf16.msra.mxu1 %v2489_v19  ;;  %v1822_v18 = vunpack.c.h.s8.bf16 %v1750_v10  ;;  %v1825_v19 = vunpack.c.l.s8.bf16 %v1753_v15 }
  0xdd   :  { %1464 = vmatprep.subr.bf16.mxu0 %v2492_v20  ;;  %1628 = vmatprep.subr.bf16.mxu1 %v2494_v21  ;;  %v1827_v20 = vunpack.c.l.s8.bf16 %v1755_v16  ;;  %v1752_v21 = vld [vmem:[#allocation2 + $0x40] sm:$0xff] }
  0xde   :  { %v1824_v23 = vunpack.c.l.s8.bf16 %v1752_v21 }
  0xe0   :  { %1465 = vmatpush1.bf16.msra.mxu0 %v2491_v28  ;;  %1629 = vmatpush1.bf16.msra.mxu1 %v2493_v29  ;;  %v1759_v28 = vld [vmem:[#allocation2 + $0x78] sm:$0xff]  ;;  %v1828_v29 = vunpack.c.h.s8.bf16 %v1752_v21 }
  0xe1   :  { %1466 = vmatprep.subr.bf16.mxu0 %v2496_v34  ;;  %1630 = vmatprep.subr.bf16.mxu1 %v2498_v35  ;;  %v1835_v32 = vunpack.c.l.s8.bf16 %v1759_v28  ;;  %v1758_v34 = vld [vmem:[#allocation2 + $0x70] sm:$0xff]  ;;  %v1832_v35 = vunpack.c.l.s8.bf16 %v1756_v33 }
  0xe2   :  { %v1834_v36 = vunpack.c.l.s8.bf16 %v1758_v34  ;;  %v1838_v42 = vunpack.c.h.s8.bf16 %v1758_v34 }
  0xe4   :  { %1467 = vmatpush1.bf16.msra.mxu0 %v2495_v38  ;;  %1631 = vmatpush1.bf16.msra.mxu1 %v2497_v39  ;;  %v1839_v38 = vunpack.c.h.s8.bf16 %v1759_v28  ;;  %v1761_v39 = vld [vmem:[#allocation2 + $0x88] sm:$0xff] }
  0xe5   :  { %1468 = vmatprep.subr.bf16.mxu0 %v2500_v40  ;;  %1632 = vmatprep.subr.bf16.mxu1 %v2502_v41  ;;  %v1763_v40 = vld [vmem:[#allocation2 + $0x98] sm:$0xff]  ;;  %v1836_v41 = vunpack.c.h.s8.bf16 %v1756_v33  ;;  %v1841_v43 = vunpack.c.l.s8.bf16 %v1761_v39  ;;  %v1684_v33 = vld [vmem:[%s3101_s2] sm:$0xf] }
  0xe6   :  { %v1843_v44 = vunpack.c.l.s8.bf16 %v1763_v40 }
  0xe8   :  { %1469 = vmatpush1.bf16.msra.mxu0 %v2499_v46  ;;  %1633 = vmatpush1.bf16.msra.mxu1 %v2501_v47  ;;  %v1762_v46 = vld [vmem:[#allocation2 + $0x90] sm:$0xff]  ;;  %v1840_v47 = vunpack.c.l.s8.bf16 %v1760_v45 }
  0xe9   :  { %1479 = vmatprep.subr.bf16.mxu0 %v2504_v49  ;;  %1643 = vmatprep.subr.bf16.mxu1 %v2506_v50  ;;  %v1842_v48 = vunpack.c.l.s8.bf16 %v1762_v46  ;;  %v1845_v49 = vunpack.c.h.s8.bf16 %v1761_v39  ;;  %v1847_v50 = vunpack.c.h.s8.bf16 %v1763_v40 }
  0xeb   :  { %1471 = vmatmul.mubr.bf16.vlgmr.msra.gmra.mrb[0].mxu0 %v75_v51  ;;  %1635 = vmatmul.mubr.bf16.vlgmr.msra.gmra.mrb[0].mxu1 %v75_v51  ;;  %v1765_v51 = vld [vmem:[#allocation2 + $0xa8] sm:$0xff] }
  0xec   :  { %1480 = vmatpush1.bf16.msra.mxu0 %v2503_v54  ;;  %1644 = vmatpush1.bf16.msra.mxu1 %v2505_v55  ;;  %v1846_v54 = vunpack.c.h.s8.bf16 %v1762_v46  ;;  %v1849_v55 = vunpack.c.l.s8.bf16 %v1765_v51  ;;  %v1853_v61 = vunpack.c.h.s8.bf16 %v1765_v51 }
  0xed   :  { %1511 = vmatprep.mubr.bf16.mxu0 %v2648_v58  ;;  %1675 = vmatprep.mubr.bf16.mxu1 %v2648_v58  ;;  %v1766_v58 = vld [vmem:[#allocation2 + $0xb0] sm:$0xff] }
  0xee   :  { %1936 = vmatprep.subr.bf16.mxu0 %v1809_v56  ;;  %2018 = vmatprep.subr.bf16.mxu1 %v1811_v57  ;;  %v1851_v56 = vunpack.c.l.s8.bf16 %v1767_v52  ;;  %v1764_v57 = vld [vmem:[#allocation2 + $0xa0] sm:$0xff]  ;;  %v1850_v60 = vunpack.c.l.s8.bf16 %v1766_v58 }
  0xef   :  { %v1848_v59 = vunpack.c.l.s8.bf16 %v1764_v57 }
  0xf7   :  { %2507 = vmatmul.mubr.msk.bf16.vlgmr.msra.gmra.mrb[0].mxu0 %vm1352_vm0, %v77_v62  ;;  %2508 = vmatmul.mubr.msk.bf16.vlgmr.msra.gmra.mrb[0].mxu1 %vm1352_vm0, %v77_v62  ;;  %v1855_v62 = vunpack.c.h.s8.bf16 %v1767_v52 }
  0xf8   :  { %1937 = vmatpush1.bf16.msra.mxu0 %v1808_v63  ;;  %2019 = vmatpush1.bf16.msra.mxu1 %v1810_v0  ;;  %v1769_v63 = vld [vmem:[#allocation2 + $0xc8] sm:$0xff]  ;;  %v1771_v0 = vld [vmem:[#allocation2 + $0xd8] sm:$0xff] }
  0xf9   :  { %1938 = vmatprep.subr.bf16.mxu0 %v1813_v1  ;;  %2020 = vmatprep.subr.bf16.mxu1 %v1815_v2  ;;  %v1852_v1 = vunpack.c.h.s8.bf16 %v1764_v57  ;;  %v1854_v2 = vunpack.c.h.s8.bf16 %v1766_v58  ;;  %v1857_v3 = vunpack.c.l.s8.bf16 %v1769_v63  ;;  %v1859_v4 = vunpack.c.l.s8.bf16 %v1771_v0 }
  0xfa   :  { %v1861_v9 = vunpack.c.h.s8.bf16 %v1769_v63  ;;  %v1863_v10 = vunpack.c.h.s8.bf16 %v1771_v0  ;;  %v1778_v63 = vld [vmem:[#allocation2 + $0x110] sm:$0xff] }
  0xfc   :  { %1939 = vmatpush1.bf16.msra.mxu0 %v1812_v5  ;;  %2021 = vmatpush1.bf16.msra.mxu1 %v1814_v6  ;;  %v1768_v5 = vld [vmem:[#allocation2 + $0xc0] sm:$0xff]  ;;  %v1770_v6 = vld [vmem:[#allocation2 + $0xd0] sm:$0xff] }
  0xfd   :  { %1940 = vmatprep.subr.bf16.mxu0 %v1817_v7  ;;  %2022 = vmatprep.subr.bf16.mxu1 %v1819_v8  ;;  %v1856_v7 = vunpack.c.l.s8.bf16 %v1768_v5  ;;  %v1858_v8 = vunpack.c.l.s8.bf16 %v1770_v6 }
 0x100   :  { %1941 = vmatpush1.bf16.msra.mxu0 %v1816_v11  ;;  %2023 = vmatpush1.bf16.msra.mxu1 %v1818_v12  ;;  %v1860_v11 = vunpack.c.h.s8.bf16 %v1768_v5  ;;  %v1862_v12 = vunpack.c.h.s8.bf16 %v1770_v6 }
 0x101   :  { %1942 = vmatprep.subr.bf16.mxu0 %v1821_v13  ;;  %2024 = vmatprep.subr.bf16.mxu1 %v1823_v14  ;;  %v1773_v13 = vld [vmem:[#allocation2 + $0xe8] sm:$0xff]  ;;  %v1775_v14 = vld [vmem:[#allocation2 + $0xf8] sm:$0xff] }
 0x102   :  { %v1865_v15 = vunpack.c.l.s8.bf16 %v1773_v13  ;;  %v1867_v16 = vunpack.c.l.s8.bf16 %v1775_v14  ;;  %v1869_v21 = vunpack.c.h.s8.bf16 %v1773_v13  ;;  %v1871_v22 = vunpack.c.h.s8.bf16 %v1775_v14 }
 0x104   :  { %1943 = vmatpush1.bf16.msra.mxu0 %v1820_v17  ;;  %2025 = vmatpush1.bf16.msra.mxu1 %v1822_v18  ;;  %v1772_v17 = vld [vmem:[#allocation2 + $0xe0] sm:$0xff]  ;;  %v1774_v18 = vld [vmem:[#allocation2 + $0xf0] sm:$0xff] }
 0x105   :  { %1944 = vmatprep.subr.bf16.mxu0 %v1825_v19  ;;  %2026 = vmatprep.subr.bf16.mxu1 %v1827_v20  ;;  %v1864_v19 = vunpack.c.l.s8.bf16 %v1772_v17  ;;  %v1866_v20 = vunpack.c.l.s8.bf16 %v1774_v18 }
 0x108   :  { %1945 = vmatpush1.bf16.msra.mxu0 %v1824_v23  ;;  %2027 = vmatpush1.bf16.msra.mxu1 %v1826_v24  ;;  %v1868_v23 = vunpack.c.h.s8.bf16 %v1772_v17  ;;  %v1870_v24 = vunpack.c.h.s8.bf16 %v1774_v18 }
 0x109   :  { %1946 = vmatprep.subr.bf16.mxu0 %v1829_v25  ;;  %2028 = vmatprep.subr.bf16.mxu1 %v1831_v26  ;;  %v3043_v25 = vld [vmem:[#allocation2 + $0x108] sm:$0xff]  ;;  %v3045_v26 = vld [vmem:[#allocation2 + $0x118] sm:$0xff] }
 0x10a   :  { %v1873_v27 = vunpack.c.l.s8.bf16 %v3043_v25  ;;  %v1875_v28 = vunpack.c.l.s8.bf16 %v3045_v26  ;;  %v1877_v6 = vunpack.c.h.s8.bf16 %v3043_v25 }
 0x10c   :  { %1947 = vmatpush1.bf16.msra.mxu0 %v1828_v29  ;;  %2029 = vmatpush1.bf16.msra.mxu1 %v1830_v30  ;;  %v1686_v29 = vlaneseq }
 0x10d   :  { %1948 = vmatprep.subr.bf16.mxu0 %v1833_v31  ;;  %2030 = vmatprep.subr.bf16.mxu1 %v1835_v32 }
 0x10e   :  { %v1687_v30 = vshrl.u32 %v1686_v29, 7 }
 0x110   :  { %1949 = vmatpush1.bf16.msra.mxu0 %v1832_v35  ;;  %2031 = vmatpush1.bf16.msra.mxu1 %v1834_v36  ;;  %v3049_v31 = vsub.s32 0, %v1687_v30  ;;  %v3051_v32 = vsub.s32 2, %v1687_v30  ;;  %v3056_v34 = vsub.s32 1, %v1687_v30  ;;  %v3058_v35 = vsub.s32 3, %v1687_v30  ;;  %v1710_v36 = vld [vmem:[%s3102_s3] sm:$0xf] }
 0x111   :  { %1950 = vmatprep.subr.bf16.mxu0 %v1837_v37  ;;  %2032 = vmatprep.subr.bf16.mxu1 %v1839_v38 }
 0x112   :  { %v1689_v37 = vrot.slane %v1684_v33, %v3049_v31  ;;  %v1697_v38 = vrot.slane %v1684_v33, %v3051_v32  ;;  %v1693_v39 = vrot.slane %v1684_v33, %v3056_v34  ;;  %v1701_v40 = vrot.slane %v1684_v33, %v3058_v35 }
 0x113   :  { %v1719_v45 = vrot.slane %v1710_v36, %v3056_v34  ;;  %v1727_v46 = vrot.slane %v1710_v36, %v3058_v35 }
 0x114   :  { %1951 = vmatpush1.bf16.msra.mxu0 %v1836_v41  ;;  %2033 = vmatpush1.bf16.msra.mxu1 %v1838_v42  ;;  %v1715_v41 = vrot.slane %v1710_v36, %v3049_v31  ;;  %v1723_v42 = vrot.slane %v1710_v36, %v3051_v32 }
 0x115   :  { %1952 = vmatprep.subr.bf16.mxu0 %v1841_v43  ;;  %2034 = vmatprep.subr.bf16.mxu1 %v1843_v44 }
 0x118   :  { %1953 = vmatpush1.bf16.msra.mxu0 %v1840_v47  ;;  %2035 = vmatpush1.bf16.msra.mxu1 %v1842_v48 }
 0x119   :  { %1954 = vmatprep.subr.bf16.mxu0 %v1845_v49  ;;  %2036 = vmatprep.subr.bf16.mxu1 %v1847_v50 }
 0x11c   :  { %1955 = vmatpush1.bf16.msra.mxu0 %v1844_v53  ;;  %2037 = vmatpush1.bf16.msra.mxu1 %v1846_v54 }
 0x11d   :  { %1956 = vmatprep.subr.bf16.mxu0 %v1849_v55  ;;  %2038 = vmatprep.subr.bf16.mxu1 %v1851_v56 }
 0x120   :  { %1957 = vmatpush1.bf16.msra.mxu0 %v1848_v59  ;;  %2039 = vmatpush1.bf16.msra.mxu1 %v1850_v60 }
 0x121   :  { %1958 = vmatprep.subr.bf16.mxu0 %v1853_v61  ;;  %2040 = vmatprep.subr.bf16.mxu1 %v1855_v62  ;;  %v1776_v62 = vld [vmem:[#allocation2 + $0x100] sm:$0xff] }
 0x124   :  { %1959 = vmatpush1.bf16.msra.mxu0 %v1852_v1  ;;  %2041 = vmatpush1.bf16.msra.mxu1 %v1854_v2 }
 0x125   :  { %1960 = vmatprep.subr.bf16.mxu0 %v1857_v3  ;;  %2042 = vmatprep.subr.bf16.mxu1 %v1859_v4  ;;  %v1872_v3 = vunpack.c.l.s8.bf16 %v1776_v62  ;;  %v1874_v4 = vunpack.c.l.s8.bf16 %v1778_v63 }
 0x128   :  { %1961 = vmatpush1.bf16.msra.mxu0 %v1856_v7  ;;  %2043 = vmatpush1.bf16.msra.mxu1 %v1858_v8  ;;  %v1879_v7 = vunpack.c.h.s8.bf16 %v3045_v26  ;;  %v1781_v8 = vld [vmem:[#allocation2 + $0x128] sm:$0xff] }
 0x129   :  { %1962 = vmatprep.subr.bf16.mxu0 %v1861_v9  ;;  %2044 = vmatprep.subr.bf16.mxu1 %v1863_v10  ;;  %v1783_v9 = vld [vmem:[#allocation2 + $0x138] sm:$0xff]  ;;  %v1881_v13 = vunpack.c.l.s8.bf16 %v1781_v8 }
 0x12a   :  { %v1883_v14 = vunpack.c.l.s8.bf16 %v1783_v9 }
 0x12c   :  { %1963 = vmatpush1.bf16.msra.mxu0 %v1860_v11  ;;  %2045 = vmatpush1.bf16.msra.mxu1 %v1862_v12  ;;  %v1876_v11 = vunpack.c.h.s8.bf16 %v1776_v62  ;;  %v1878_v12 = vunpack.c.h.s8.bf16 %v1778_v63  ;;  %v1797_v62 = vld [vmem:[#allocation2 + $0x1a8] sm:$0xff]  ;;  %v1799_v63 = vld [vmem:[#allocation2 + $0x1b8] sm:$0xff] }
 0x12d   :  { %1964 = vmatprep.subr.bf16.mxu0 %v1865_v15  ;;  %2046 = vmatprep.subr.bf16.mxu1 %v1867_v16  ;;  %v1780_v15 = vld [vmem:[#allocation2 + $0x120] sm:$0xff]  ;;  %v1782_v16 = vld [vmem:[#allocation2 + $0x130] sm:$0xff] }
 0x12e   :  { %v1880_v17 = vunpack.c.l.s8.bf16 %v1780_v15  ;;  %v1882_v18 = vunpack.c.l.s8.bf16 %v1782_v16 }
 0x130   :  { %1965 = vmatpush1.bf16.msra.mxu0 %v1864_v19  ;;  %2047 = vmatpush1.bf16.msra.mxu1 %v1866_v20  ;;  %v1885_v19 = vunpack.c.h.s8.bf16 %v1781_v8  ;;  %v1887_v20 = vunpack.c.h.s8.bf16 %v1783_v9  ;;  %v1917_v8 = vunpack.c.h.s8.bf16 %v1797_v62  ;;  %v1919_v9 = vunpack.c.h.s8.bf16 %v1799_v63 }
 0x131   :  { %1966 = vmatprep.subr.bf16.mxu0 %v1869_v21  ;;  %2048 = vmatprep.subr.bf16.mxu1 %v1871_v22  ;;  %v1785_v21 = vld [vmem:[#allocation2 + $0x148] sm:$0xff]  ;;  %v1787_v22 = vld [vmem:[#allocation2 + $0x158] sm:$0xff] }
 0x132   :  { %v1889_v25 = vunpack.c.l.s8.bf16 %v1785_v21  ;;  %v1891_v26 = vunpack.c.l.s8.bf16 %v1787_v22  ;;  %v1893_v33 = vunpack.c.h.s8.bf16 %v1785_v21  ;;  %v1895_v36 = vunpack.c.h.s8.bf16 %v1787_v22  ;;  %v1805_v22 = vld [vmem:[#allocation2 + $0x1e8] sm:$0xff] }
 0x134   :  { %1967 = vmatpush1.bf16.msra.mxu0 %v1868_v23  ;;  %2049 = vmatpush1.bf16.msra.mxu1 %v1870_v24  ;;  %v1884_v23 = vunpack.c.h.s8.bf16 %v1780_v15  ;;  %v1886_v24 = vunpack.c.h.s8.bf16 %v1782_v16  ;;  %v1800_v16 = vld [vmem:[#allocation2 + $0x1c0] sm:$0xff] }
 0x135   :  { %1977 = vmatprep.subr.bf16.mxu0 %v1873_v27  ;;  %2059 = vmatprep.subr.bf16.mxu1 %v1875_v28  ;;  %v1784_v27 = vld [vmem:[#allocation2 + $0x140] sm:$0xff]  ;;  %v1786_v28 = vld [vmem:[#allocation2 + $0x150] sm:$0xff] }
 0x136   :  { %v1888_v29 = vunpack.c.l.s8.bf16 %v1784_v27  ;;  %v1890_v30 = vunpack.c.l.s8.bf16 %v1786_v28 }
 0x1ca   :  { %v1513_v43 = vpop.f32.mrb[0].mxu0  ;;  %v1677_v44 = vpop.f32.mrb[0].mxu1 }
 0x1cb   :  { %v1706_v47 = vmul.f32 %v1689_v37, %v1513_v43  ;;  %v1708_v48 = vmul.f32 %v1697_v38, %v1677_v44  ;;  %v1515_v49 = vpop.f32.mrb[1].mxu0  ;;  %v1679_v50 = vpop.f32.mrb[1].mxu1  ;;  %v1789_v37 = vld [vmem:[#allocation2 + $0x168] sm:$0xff]  ;;  %v1791_v38 = vld [vmem:[#allocation2 + $0x178] sm:$0xff]  ;;  %v1788_v43 = vld [vmem:[#allocation2 + $0x160] sm:$0xff] }
 0x1cc   :  { %v1707_v51 = vmul.f32 %v1693_v39, %v1515_v49  ;;  %v1709_v52 = vmul.f32 %v1701_v40, %v1679_v50  ;;  %v1517_v53 = vpop.f32.mrb[2].mxu0  ;;  %v1681_v54 = vpop.f32.mrb[2].mxu1  ;;  %v1892_v39 = vunpack.c.h.s8.bf16 %v1784_v27  ;;  %v1894_v40 = vunpack.c.h.s8.bf16 %v1786_v28  ;;  %v1790_v44 = vld [vmem:[#allocation2 + $0x170] sm:$0xff]  ;;  %v1793_v49 = vld [vmem:[#allocation2 + $0x188] sm:$0xff]  ;;  %v1795_v50 = vld [vmem:[#allocation2 + $0x198] sm:$0xff] }
 0x1cd   :  { %v1732_v55 = vadd.f32 %v1715_v41, %v1706_v47  ;;  %v3071_v56 = vadd.f32 %v1723_v42, %v1708_v48  ;;  %v1518_v57 = vpop.f32.mrb[3].mxu0  ;;  %v1682_v58 = vpop.f32.mrb[3].mxu1  ;;  %v1897_v41 = vunpack.c.l.s8.bf16 %v1789_v37  ;;  %v1899_v42 = vunpack.c.l.s8.bf16 %v1791_v38  ;;  %v1804_v28 = vld [vmem:[#allocation2 + $0x1e0] sm:$0xff] }
 0x1ce   :  { %v1733_v59 = vadd.f32 %v1719_v45, %v1707_v51  ;;  %v1735_v60 = vadd.f32 %v1727_v46, %v1709_v52  ;;  %v1896_v45 = vunpack.c.l.s8.bf16 %v1788_v43  ;;  %v1898_v46 = vunpack.c.l.s8.bf16 %v1790_v44  ;;  %v1794_v57 = vld [vmem:[#allocation2 + $0x190] sm:$0xff] }
 0x1cf   :  { %v1736_v61 = vmax.f32 %v1732_v55, 0.0  ;;  %v1901_v47 = vunpack.c.h.s8.bf16 %v1789_v37  ;;  %v1903_v48 = vunpack.c.h.s8.bf16 %v1791_v38  ;;  %v1900_v51 = vunpack.c.h.s8.bf16 %v1788_v43  ;;  %v1792_v55 = vld [vmem:[#allocation2 + $0x180] sm:$0xff] }
 0x1d0   :  { %v1737_v0 = vmax.f32 %v1733_v59, 0.0  ;;  %v1739_v1 = vmax.f32 %v1735_v60, 0.0  ;;  %v1902_v52 = vunpack.c.h.s8.bf16 %v1790_v44  ;;  %v1905_v53 = vunpack.c.l.s8.bf16 %v1793_v49  ;;  %v2164_v38 = vld [vmem:[#allocation4 + $0x20] sm:$0xff] }
 0x1d1   :  { %v1740_v5 = vpack.c.bf16 %v1736_v61, %v1736_v61  ;;  %v1907_v54 = vunpack.c.l.s8.bf16 %v1795_v50  ;;  %v1904_v58 = vunpack.c.l.s8.bf16 %v1792_v55  ;;  %v1906_v59 = vunpack.c.l.s8.bf16 %v1794_v57 }
 0x1d2   :  { %v1741_v2 = vpack.c.bf16 %v1737_v0, %v1737_v0  ;;  %v1743_v10 = vpack.c.bf16 %v1739_v1, %v1739_v1  ;;  %v1909_v60 = vunpack.c.h.s8.bf16 %v1793_v49  ;;  %v1911_v61 = vunpack.c.h.s8.bf16 %v1795_v50 }
 0x1d3   :  { %v1908_v0 = vunpack.c.h.s8.bf16 %v1792_v55  ;;  %v1910_v1 = vunpack.c.h.s8.bf16 %v1794_v57  ;;  %v2184_v43 = vunpack.c.l.s8.bf16 %v2164_v38  ;;  %v2185_v50 = vunpack.c.h.s8.bf16 %v2164_v38 }
 0x1d4   :  { %1968 = vmatprep.mubr.bf16.mxu0 %v1741_v2  ;;  %2050 = vmatprep.mubr.bf16.mxu1 %v1741_v2  ;;  %v1913_v2 = vunpack.c.l.s8.bf16 %v1797_v62 }
 0x1d5   :  { %1969 = vmatmul.mubr.bf16.vlgmr.msra.gmra.mrb[4].mxu0 %v1740_v5  ;;  %2051 = vmatmul.mubr.bf16.vlgmr.msra.gmra.mrb[4].mxu1 %v1740_v5  ;;  %v1798_v5 = vld [vmem:[#allocation2 + $0x1b0] sm:$0xff] }
 0x1d6   :  { %1978 = vmatpush1.bf16.msra.mxu0 %v1872_v3  ;;  %2060 = vmatpush1.bf16.msra.mxu1 %v1874_v4  ;;  %v1915_v3 = vunpack.c.l.s8.bf16 %v1799_v63  ;;  %v1796_v4 = vld [vmem:[#allocation2 + $0x1a0] sm:$0xff] }
 0x1d7   :  { %2009 = vmatprep.mubr.bf16.mxu0 %v1743_v10  ;;  %2091 = vmatprep.mubr.bf16.mxu1 %v1743_v10  ;;  %v1801_v10 = vld [vmem:[#allocation2 + $0x1c8] sm:$0xff] }
 0x1d8   :  { %1979 = vmatprep.subr.bf16.mxu0 %v1877_v6  ;;  %2061 = vmatprep.subr.bf16.mxu1 %v1879_v7  ;;  %v1912_v6 = vunpack.c.l.s8.bf16 %v1796_v4  ;;  %v1914_v7 = vunpack.c.l.s8.bf16 %v1798_v5 }
 0x1da   :  { %1980 = vmatpush1.bf16.msra.mxu0 %v1876_v11  ;;  %2062 = vmatpush1.bf16.msra.mxu1 %v1878_v12  ;;  %v1803_v11 = vld [vmem:[#allocation2 + $0x1d8] sm:$0xff]  ;;  %v1916_v12 = vunpack.c.h.s8.bf16 %v1796_v4 }
 0x1db   :  { %1981 = vmatprep.subr.bf16.mxu0 %v1881_v13  ;;  %2063 = vmatprep.subr.bf16.mxu1 %v1883_v14  ;;  %v1918_v13 = vunpack.c.h.s8.bf16 %v1798_v5  ;;  %v1921_v14 = vunpack.c.l.s8.bf16 %v1801_v10  ;;  %v1923_v15 = vunpack.c.l.s8.bf16 %v1803_v11  ;;  %v1927_v21 = vunpack.c.h.s8.bf16 %v1803_v11 }
 0x1de   :  { %1982 = vmatpush1.bf16.msra.mxu0 %v1880_v17  ;;  %2064 = vmatpush1.bf16.msra.mxu1 %v1882_v18  ;;  %v1802_v17 = vld [vmem:[#allocation2 + $0x1d0] sm:$0xff]  ;;  %v1920_v18 = vunpack.c.l.s8.bf16 %v1800_v16 }
 0x1df   :  { %1983 = vmatprep.subr.bf16.mxu0 %v1885_v19  ;;  %2065 = vmatprep.subr.bf16.mxu1 %v1887_v20  ;;  %v1922_v19 = vunpack.c.l.s8.bf16 %v1802_v17  ;;  %v1925_v20 = vunpack.c.h.s8.bf16 %v1801_v10 }
 0x1e2   :  { %1984 = vmatpush1.bf16.msra.mxu0 %v1884_v23  ;;  %2066 = vmatpush1.bf16.msra.mxu1 %v1886_v24  ;;  %v1807_v23 = vld [vmem:[#allocation2 + $0x1f8] sm:$0xff]  ;;  %v1924_v24 = vunpack.c.h.s8.bf16 %v1800_v16 }
 0x1e3   :  { %1985 = vmatprep.subr.bf16.mxu0 %v1889_v25  ;;  %2067 = vmatprep.subr.bf16.mxu1 %v1891_v26  ;;  %v1926_v25 = vunpack.c.h.s8.bf16 %v1802_v17  ;;  %v1929_v26 = vunpack.c.l.s8.bf16 %v1805_v22  ;;  %v1931_v27 = vunpack.c.l.s8.bf16 %v1807_v23  ;;  %v1935_v37 = vunpack.c.h.s8.bf16 %v1807_v23 }
 0x1e6   :  { %1986 = vmatpush1.bf16.msra.mxu0 %v1888_v29  ;;  %2068 = vmatpush1.bf16.msra.mxu1 %v1890_v30  ;;  %v1806_v29 = vld [vmem:[#allocation2 + $0x1f0] sm:$0xff]  ;;  %v1928_v30 = vunpack.c.l.s8.bf16 %v1804_v28 }
 0x1e7   :  { %1987 = vmatprep.subr.bf16.mxu0 %v1893_v33  ;;  %2069 = vmatprep.subr.bf16.mxu1 %v1895_v36  ;;  %v1930_v33 = vunpack.c.l.s8.bf16 %v1806_v29  ;;  %v1933_v36 = vunpack.c.h.s8.bf16 %v1805_v22 }
 0x1ea   :  { %1988 = vmatpush1.bf16.msra.mxu0 %v1892_v39  ;;  %2070 = vmatpush1.bf16.msra.mxu1 %v1894_v40  ;;  %v2172_v39 = vld [vmem:[#allocation4 + $0x60] sm:$0xff]  ;;  %v1932_v40 = vunpack.c.h.s8.bf16 %v1804_v28 }
 0x1eb   :  { %1989 = vmatprep.subr.bf16.mxu0 %v1897_v41  ;;  %2071 = vmatprep.subr.bf16.mxu1 %v1899_v42  ;;  %v1934_v41 = vunpack.c.h.s8.bf16 %v1806_v29  ;;  %v1738_v42 = vmax.f32 %v3071_v56, 0.0  ;;  %v2200_v44 = vunpack.c.l.s8.bf16 %v2172_v39 }
 0x1ed   :  { %v1742_v49 = vpack.c.bf16 %v1738_v42, %v1738_v42 }
 0x1ee   :  { %1990 = vmatpush1.bf16.msra.mxu0 %v1896_v45  ;;  %2072 = vmatpush1.bf16.msra.mxu1 %v1898_v46  ;;  %v2160_v45 = vld [vmem:[#allocation4] sm:$0xff] }
 0x1ef   :  { %1991 = vmatprep.subr.bf16.mxu0 %v1901_v47  ;;  %2073 = vmatprep.subr.bf16.mxu1 %v1903_v48  ;;  %v2168_v46 = vld [vmem:[#allocation4 + $0x40] sm:$0xff]  ;;  %v2176_v47 = vunpack.c.l.s8.bf16 %v2160_v45  ;;  %v2177_v56 = vunpack.c.h.s8.bf16 %v2160_v45 }
 0x1f0   :  { %v2192_v48 = vunpack.c.l.s8.bf16 %v2168_v46 }
 0x1f2   :  { %1992 = vmatpush1.bf16.msra.mxu0 %v1900_v51  ;;  %2074 = vmatpush1.bf16.msra.mxu1 %v1902_v52  ;;  %v2201_v51 = vunpack.c.h.s8.bf16 %v2172_v39  ;;  %v2165_v52 = vld [vmem:[#allocation4 + $0x28] sm:$0xff] }
 0x1f3   :  { %1993 = vmatprep.subr.bf16.mxu0 %v1905_v53  ;;  %2075 = vmatprep.subr.bf16.mxu1 %v1907_v54  ;;  %v2173_v53 = vld [vmem:[#allocation4 + $0x68] sm:$0xff]  ;;  %v2193_v54 = vunpack.c.h.s8.bf16 %v2168_v46  ;;  %v2186_v55 = vunpack.c.l.s8.bf16 %v2165_v52  ;;  %v2187_v62 = vunpack.c.h.s8.bf16 %v2165_v52 }
 0x1f4   :  { %v2202_v57 = vunpack.c.l.s8.bf16 %v2173_v53  ;;  %v2203_v63 = vunpack.c.h.s8.bf16 %v2173_v53 }
 0x1f6   :  { %1994 = vmatpush1.bf16.msra.mxu0 %v1904_v58  ;;  %2076 = vmatpush1.bf16.msra.mxu1 %v1906_v59  ;;  %v2161_v58 = vld [vmem:[#allocation4 + $0x8] sm:$0xff] }
 0x1f7   :  { %1995 = vmatprep.subr.bf16.mxu0 %v1909_v60  ;;  %2077 = vmatprep.subr.bf16.mxu1 %v1911_v61  ;;  %v2169_v59 = vld [vmem:[#allocation4 + $0x48] sm:$0xff]  ;;  %v2178_v60 = vunpack.c.l.s8.bf16 %v2161_v58 }
 0x1f8   :  { %v2194_v61 = vunpack.c.l.s8.bf16 %v2169_v59 }
 0x1fa   :  { %1996 = vmatpush1.bf16.msra.mxu0 %v1908_v0  ;;  %2078 = vmatpush1.bf16.msra.mxu1 %v1910_v1  ;;  %v2166_v0 = vld [vmem:[#allocation4 + $0x30] sm:$0xff] }
 0x1fb   :  { %1997 = vmatprep.subr.bf16.mxu0 %v1913_v2  ;;  %2079 = vmatprep.subr.bf16.mxu1 %v1915_v3  ;;  %v2174_v1 = vld [vmem:[#allocation4 + $0x70] sm:$0xff]  ;;  %v2179_v2 = vunpack.c.h.s8.bf16 %v2161_v58  ;;  %v2195_v3 = vunpack.c.h.s8.bf16 %v2169_v59  ;;  %v2188_v4 = vunpack.c.l.s8.bf16 %v2166_v0  ;;  %v2189_v10 = vunpack.c.h.s8.bf16 %v2166_v0 }
 0x1fc   :  { %v2204_v5 = vunpack.c.l.s8.bf16 %v2174_v1  ;;  %v2205_v11 = vunpack.c.h.s8.bf16 %v2174_v1 }
 0x1fe   :  { %1998 = vmatpush1.bf16.msra.mxu0 %v1912_v6  ;;  %2080 = vmatpush1.bf16.msra.mxu1 %v1914_v7  ;;  %v2162_v6 = vld [vmem:[#allocation4 + $0x10] sm:$0xff] }
 0x1ff   :  { %1999 = vmatprep.subr.bf16.mxu0 %v1917_v8  ;;  %2081 = vmatprep.subr.bf16.mxu1 %v1919_v9  ;;  %v2170_v7 = vld [vmem:[#allocation4 + $0x50] sm:$0xff]  ;;  %v2180_v8 = vunpack.c.l.s8.bf16 %v2162_v6 }
 0x200   :  { %v2196_v9 = vunpack.c.l.s8.bf16 %v2170_v7 }
 0x202   :  { %2000 = vmatpush1.bf16.msra.mxu0 %v1916_v12  ;;  %2082 = vmatpush1.bf16.msra.mxu1 %v1918_v13  ;;  %v2181_v12 = vunpack.c.h.s8.bf16 %v2162_v6  ;;  %v2197_v13 = vunpack.c.h.s8.bf16 %v2170_v7 }
 0x203   :  { %2001 = vmatprep.subr.bf16.mxu0 %v1921_v14  ;;  %2083 = vmatprep.subr.bf16.mxu1 %v1923_v15  ;;  %v2167_v14 = vld [vmem:[#allocation4 + $0x38] sm:$0xff] }
 0x204   :  { %v2175_v15 = vld [vmem:[#allocation4 + $0x78] sm:$0xff]  ;;  %v2190_v16 = vunpack.c.l.s8.bf16 %v2167_v14  ;;  %v2191_v22 = vunpack.c.h.s8.bf16 %v2167_v14 }
 0x205   :  { %v2206_v17 = vunpack.c.l.s8.bf16 %v2175_v15  ;;  %v2207_v23 = vunpack.c.h.s8.bf16 %v2175_v15 }
 0x206   :  { %2002 = vmatpush1.bf16.msra.mxu0 %v1920_v18  ;;  %2084 = vmatpush1.bf16.msra.mxu1 %v1922_v19  ;;  %v2163_v18 = vld [vmem:[#allocation4 + $0x18] sm:$0xff] }
 0x207   :  { %2003 = vmatprep.subr.bf16.mxu0 %v1925_v20  ;;  %2085 = vmatprep.subr.bf16.mxu1 %v1927_v21  ;;  %v2171_v19 = vld [vmem:[#allocation4 + $0x58] sm:$0xff]  ;;  %v2182_v20 = vunpack.c.l.s8.bf16 %v2163_v18 }
 0x208   :  { %v2198_v21 = vunpack.c.l.s8.bf16 %v2171_v19 }
 0x20a   :  { %2004 = vmatpush1.bf16.msra.mxu0 %v1924_v24  ;;  %2086 = vmatpush1.bf16.msra.mxu1 %v1926_v25  ;;  %v2183_v24 = vunpack.c.h.s8.bf16 %v2163_v18  ;;  %v2199_v25 = vunpack.c.h.s8.bf16 %v2171_v19 }
 0x20b   :  { %2005 = vmatprep.subr.bf16.mxu0 %v1929_v26  ;;  %2087 = vmatprep.subr.bf16.mxu1 %v1931_v27  ;;  %v2100_v26 = vld [vmem:[%s3104_s5] sm:$0xf] }
 0x20c   :  { %v2126_v27 = vld [vmem:[%s3105_s6] sm:$0xf]  ;;  %v2105_v28 = vrot.slane %v2100_v26, %v3049_v31  ;;  %v2113_v29 = vrot.slane %v2100_v26, %v3051_v32 }
 0x20e   :  { %2006 = vmatpush1.bf16.msra.mxu0 %v1928_v30  ;;  %2088 = vmatpush1.bf16.msra.mxu1 %v1930_v33  ;;  %v2109_v30 = vrot.slane %v2100_v26, %v3056_v34  ;;  %v2117_v33 = vrot.slane %v2100_v26, %v3058_v35 }
 0x20f   :  { %2007 = vmatprep.subr.bf16.mxu0 %v1933_v36  ;;  %2089 = vmatprep.subr.bf16.mxu1 %v1935_v37  ;;  %v2131_v36 = vrot.slane %v2126_v27, %v3049_v31  ;;  %v2139_v37 = vrot.slane %v2126_v27, %v3051_v32 }
 0x212   :  { %2008 = vmatpush1.bf16.msra.mxu0 %v1932_v40  ;;  %2090 = vmatpush1.bf16.msra.mxu1 %v1934_v41  ;;  %v2135_v40 = vrot.slane %v2126_v27, %v3056_v34  ;;  %v2143_v41 = vrot.slane %v2126_v27, %v3058_v35 }
 0x213   :  { %2511 = vmatprep.subr.bf16.mxu0 %v2184_v43  ;;  %2533 = vmatprep.subr.bf16.mxu1 %v2200_v44 }
 0x215   :  { %2010 = vmatmul.mubr.bf16.vlgmr.msra.gmra.mrb[4].mxu0 %v1742_v49  ;;  %2092 = vmatmul.mubr.bf16.vlgmr.msra.gmra.mrb[4].mxu1 %v1742_v49 }
 0x216   :  { %2512 = vmatpush3.bf16.msra.mxu0 %v2176_v47  ;;  %2534 = vmatpush3.bf16.msra.mxu1 %v2192_v48 }
 0x217   :  { %2513 = vmatprep.subr.bf16.mxu0 %v2185_v50  ;;  %2535 = vmatprep.subr.bf16.mxu1 %v2201_v51 }
 0x21a   :  { %2514 = vmatpush3.bf16.msra.mxu0 %v2177_v56  ;;  %2536 = vmatpush3.bf16.msra.mxu1 %v2193_v54 }
 0x21b   :  { %2515 = vmatprep.subr.bf16.mxu0 %v2186_v55  ;;  %2537 = vmatprep.subr.bf16.mxu1 %v2202_v57 }
 0x21e   :  { %2516 = vmatpush3.bf16.msra.mxu0 %v2178_v60  ;;  %2538 = vmatpush3.bf16.msra.mxu1 %v2194_v61 }
 0x21f   :  { %2517 = vmatprep.subr.bf16.mxu0 %v2187_v62  ;;  %2539 = vmatprep.subr.bf16.mxu1 %v2203_v63 }
 0x222   :  { %2518 = vmatpush3.bf16.msra.mxu0 %v2179_v2  ;;  %2540 = vmatpush3.bf16.msra.mxu1 %v2195_v3 }
 0x223   :  { %2519 = vmatprep.subr.bf16.mxu0 %v2188_v4  ;;  %2541 = vmatprep.subr.bf16.mxu1 %v2204_v5  ;;  %v2509_v4 = vld [vmem:[%s3107_s8] ss:$0 sm:$0xff] }
 0x226   :  { %2520 = vmatpush3.bf16.msra.mxu0 %v2180_v8  ;;  %2542 = vmatpush3.bf16.msra.mxu1 %v2196_v9  ;;  %v2510_v8 = vld [vmem:[%s3108_s9] ss:$0 sm:$0xff] }
 0x227   :  { %2521 = vmatprep.subr.bf16.mxu0 %v2189_v10  ;;  %2543 = vmatprep.subr.bf16.mxu1 %v2205_v11 }
 0x22a   :  { %2522 = vmatpush3.bf16.msra.mxu0 %v2181_v12  ;;  %2544 = vmatpush3.bf16.msra.mxu1 %v2197_v13 }
 0x22b   :  { %2523 = vmatprep.subr.bf16.mxu0 %v2190_v16  ;;  %2545 = vmatprep.subr.bf16.mxu1 %v2206_v17 }
 0x22e   :  { %2524 = vmatpush3.bf16.msra.mxu0 %v2182_v20  ;;  %2546 = vmatpush3.bf16.msra.mxu1 %v2198_v21 }
 0x22f   :  { %2525 = vmatprep.subr.bf16.mxu0 %v2191_v22  ;;  %2547 = vmatprep.subr.bf16.mxu1 %v2207_v23 }
 0x232   :  { %2526 = vmatpush3.bf16.msra.mxu0 %v2183_v24  ;;  %2548 = vmatpush3.bf16.msra.mxu1 %v2199_v25 }
 0x2e8   :  { %v2011_v38 = vpop.f32.mrb[4].mxu0  ;;  %v2093_v39 = vpop.f32.mrb[4].mxu1 }
 0x2e9   :  { %v2122_v42 = vmul.f32 %v2105_v28, %v2011_v38  ;;  %v2124_v43 = vmul.f32 %v2113_v29, %v2093_v39  ;;  %v2013_v44 = vpop.f32.mrb[5].mxu0  ;;  %v2095_v45 = vpop.f32.mrb[5].mxu1 }
 0x2ea   :  { %v2123_v46 = vmul.f32 %v2109_v30, %v2013_v44  ;;  %v2125_v47 = vmul.f32 %v2117_v33, %v2095_v45  ;;  %v2015_v48 = vpop.f32.mrb[6].mxu0  ;;  %v2097_v49 = vpop.f32.mrb[6].mxu1 }
 0x2eb   :  { %v2148_v50 = vadd.f32 %v2131_v36, %v2122_v42  ;;  %v2150_v51 = vadd.f32 %v2139_v37, %v2124_v43  ;;  %v2016_v52 = vpop.f32.mrb[7].mxu0  ;;  %v2098_v31 = vpop.f32.mrb[7].mxu1 }
 0x2ec   :  { %v2149_v53 = vadd.f32 %v2135_v40, %v2123_v46  ;;  %v2151_v32 = vadd.f32 %v2143_v41, %v2125_v47 }
 0x2ed   :  { %v2152_v56 = vmax.f32 %v2148_v50, 0.0  ;;  %v2154_v54 = vmax.f32 %v2150_v51, 0.0 }
 0x2ee   :  { %v2153_v55 = vmax.f32 %v2149_v53, 0.0  ;;  %v2155_v34 = vmax.f32 %v2151_v32, 0.0 }
 0x2ef   :  { %v2156_v58 = vpack.c.bf16 %v2152_v56, %v2152_v56  ;;  %v2158_v59 = vpack.c.bf16 %v2154_v54, %v2154_v54 }
 0x2f0   :  { %v2157_v57 = vpack.c.bf16 %v2153_v55, %v2153_v55  ;;  %v2159_v35 = vpack.c.bf16 %v2155_v34, %v2155_v34 }
 0x2f2   :  { %2240 = vmatprep.mubr.bf16.mxu0 %v2157_v57  ;;  %2280 = vmatprep.mubr.bf16.mxu1 %v2159_v35 }
 0x2f3   :  { %2241 = vmatmul.mubr.bf16.vlgmr.msra.gmra.mrb[8].mxu0 %v2156_v58  ;;  %2281 = vmatmul.mubr.bf16.vlgmr.msra.gmra.mrb[8].mxu1 %v2158_v59 }
 0x3c6   :  { %v2527_v60 = vpop.f32.mrb[8].mxu0  ;;  %v2549_v61 = vpop.f32.mrb[8].mxu1 }
 0x3c7   :  { %v2528_v62 = vpop.f32.mrb[9].mxu0  ;;  %v2550_v63 = vpop.f32.mrb[9].mxu1 }
 0x3c8   :  { %v2529_v0 = vadd.f32 %v2528_v62, %v2527_v60  ;;  %v2551_v1 = vadd.f32 %v2550_v63, %v2549_v61  ;;  %v2530_v2 = vpop.f32.mrb[10].mxu0  ;;  %v2552_v3 = vpop.f32.mrb[10].mxu1 }
 0x3c9   :  { %v2531_v5 = vpop.f32.mrb[11].mxu0  ;;  %v2553_v6 = vpop.f32.mrb[11].mxu1 }
 0x3ca   :  { %v2283_v7 = vadd.f32 %v2551_v1, %v2529_v0 }
 0x3cc   :  { %v2295_v9 = vmul.f32 %v2509_v4, %v2283_v7 }
 0x3ce   :  { %v2303_v10 = vadd.f32 %v2510_v8, %v2295_v9 }
 0x3d0   :  { %2304 = vst [vmem:[%s3109_s10] sm:$0xff] %v2303_v10 }
 0x3d1   :  { %2309 = vsyncpa [#allocation3], 1 }
 0x3d2   :  { %2310 = vsyncpa [#allocation5], 1 }

</bundles_post_ra>
